<compile_context>
chip_gen: v5e
topology: v5e:2x2
jax: 0.10.0
libtpu: 0.0.40
codegen_flags: <defaults>
</compile_context>

<pallas_src>
import functools

import jax
import jax.numpy as jnp
from jax.experimental import pallas as pl
from jax.experimental.pallas import tpu as pltpu

KSIZE = 3
STRIDE = 1
RATE = 2
SOFTMAX_SCALE = 10.0
FUSE = False          # module default; fuse branch not exercised
_TP_TARGET = 512      # foreground-position tile (multiple of 128)
_TL_TARGET = 1024     # background-position tile (multiple of 128)
_BIG = 1e30


def _round_up(x, m):
    return -(-x // m) * m


# ---------------------------------------------------------------------------
# Glue: 'same' padding + unfold (torch extract_image_patches), nearest downsample
# ---------------------------------------------------------------------------
def _same_pad_amounts(size, k, stride):
    out = -(-size // stride)
    pad = max(0, (out - 1) * stride + k - size)
    lo = pad // 2
    return lo, pad - lo, out


def _unfold_same(x, k, stride):
    """x: [N, C, H, W] -> patches [N, out_h*out_w, C*k*k], flatten order (c, kh, kw)."""
    N, C, H, W = x.shape
    pt, pb, out_h = _same_pad_amounts(H, k, stride)
    plft, prgt, out_w = _same_pad_amounts(W, k, stride)
    xp = jnp.pad(x, ((0, 0), (0, 0), (pt, pb), (plft, prgt)))
    cols = []
    for kh in range(k):
        for kw in range(k):
            cols.append(xp[:, :, kh:kh + out_h * stride:stride,
                               kw:kw + out_w * stride:stride])
    p = jnp.stack(cols, axis=2)                       # [N, C, k*k, out_h, out_w]
    p = p.reshape(N, C * k * k, out_h, out_w)
    p = p.transpose(0, 2, 3, 1).reshape(N, out_h * out_w, C * k * k)
    return p, out_h, out_w


def _vmem_cap_bytes():
    try:
        info = pltpu.get_tpu_info()
        cap = getattr(info, "vmem_capacity_bytes", None)
        if cap:
            return int(cap)
    except Exception:
        pass
    return 64 << 20


# ---------------------------------------------------------------------------
# Pallas kernel: online-softmax contextual attention over background tiles
# ---------------------------------------------------------------------------
def _ctx_attn_kernel(fp_ref, wt_ref, rw_ref, sc_ref, out_ref, arg_ref,
                     m_sc, l_sc, acc_sc, bv_sc, bi_sc,
                     *, add_pad_bias, separate_arg_bias):
    li = pl.program_id(2)
    n_l = pl.num_programs(2)
    tL = wt_ref.shape[2]

    @pl.when(li == 0)
    def _init():
        m_sc[...] = jnp.full_like(m_sc, -jnp.inf)
        l_sc[...] = jnp.zeros_like(l_sc)
        acc_sc[...] = jnp.zeros_like(acc_sc)
        bv_sc[...] = jnp.full_like(bv_sc, -jnp.inf)
        bi_sc[...] = jnp.zeros_like(bi_sc)

    fp = fp_ref[0]                        # (tP, CKp)    bf16 foreground 3x3 patches
    wt = wt_ref[0]                        # (CKp, tL)    bf16 background 3x3 patches^T
    rw = rw_ref[0]                        # (tL, CKRp)   bf16 raw (2*rate)^2 bg patches (mask folded in)
    sc = sc_ref[0]                        # (3, tL)  f32: [mm*scale/||w||, pad_bias, arg_bias]
    row_scale = sc[0:1, :]

    # cosine scores * softmax_scale * mask; ||w|| normalization folded into row_scale
    s = jnp.dot(fp, wt, preferred_element_type=jnp.float32) * row_scale     # (tP, tL)
    s_smax = s + sc[1:2, :] if add_pad_bias else s   # L-padding columns -> -BIG

    # ---- online softmax (torch-faithful: masked real columns keep score 0) ----
    m_old = m_sc[...]                                        # (tP, 1)
    tile_max = jnp.max(s_smax, axis=1, keepdims=True)
    m_new = jnp.maximum(m_old, tile_max)
    alpha = jnp.exp(m_old - m_new)
    e = jnp.exp(s_smax - m_new)                              # (tP, tL) f32
    l_sc[...] = alpha * l_sc[...] + jnp.sum(e, axis=1, keepdims=True)
    acc_sc[...] = alpha * acc_sc[...] + jnp.dot(e.astype(jnp.bfloat16), rw,
                                                preferred_element_type=jnp.float32)
    m_sc[...] = m_new

    # ---- running argmax (first-index-wins; all-masked row -> 0 like torch) ----
    if separate_arg_bias:
        s_arg = s + sc[2:3, :]
        arg_max = jnp.max(s_arg, axis=1, keepdims=True)
        prev_best = bv_sc[...]
        bv_sc[...] = jnp.maximum(prev_best, arg_max)
    else:
        # mask=None fast path: argmax input == softmax input, reuse its max
        s_arg = s_smax
        arg_max = tile_max
        prev_best = m_old
    ids = jax.lax.broadcasted_iota(jnp.int32, s_arg.shape, 1) + li * tL
    cand = jnp.where(s_arg == arg_max, ids, jnp.int32(jnp.iinfo(jnp.int32).max))
    t_arg = jnp.min(cand, axis=1, keepdims=True)             # (tP, 1) int32
    better = arg_max > prev_best
    bi_sc[...] = jnp.where(better, t_arg, bi_sc[...])

    @pl.when(li == n_l - 1)
    def _finalize():
        inv = pl.reciprocal(l_sc[...], approx=True)
        out_ref[0] = (acc_sc[...] * inv).astype(out_ref.dtype)
        arg_ref[0] = bi_sc[...]


def _attention_pallas(f_patches, w_t, raw_patches, scale_rows, *, tP, tL,
                      add_pad_bias, separate_arg_bias):
    # f_patches   [B, P_pad, CKp]      bf16
    # w_t         [B, CKp, L_pad]      bf16
    # raw_patches [B, L_pad, CKRp]     bf16 (mask folded in, lane-dense)
    # scale_rows  [B, 3, L_pad]        f32
    B, P_pad, CKp = f_patches.shape
    L_pad = w_t.shape[2]
    CKRp = raw_patches.shape[2]
    assert P_pad % tP == 0 and L_pad % tL == 0
    n_p = P_pad // tP
    n_l = L_pad // tL

    kernel = functools.partial(_ctx_attn_kernel, add_pad_bias=add_pad_bias,
                               separate_arg_bias=separate_arg_bias)

    tile_bytes = (
        2 * 2 * (tP * CKp + CKp * tL + tL * CKRp)      # bf16 inputs, double-buffered
        + 2 * 4 * 3 * tL                               # f32 scale/bias rows, double-buffered
        + 2 * (2 * tP * CKRp + 4 * tP)                 # bf16 patch + int32 arg outputs, x2
        + 4 * tP * CKRp + 4 * 4 * tP                   # f32 acc scratch + small vectors
        + 6 * 4 * tP * tL                              # ~6 live (tP, tL) f32/i32 temporaries
    )
    cap = _vmem_cap_bytes()
    vmem_limit = int(min(max(2 * tile_bytes, 32 << 20), cap - (12 << 20)))

    out_shape = (
        jax.ShapeDtypeStruct((B, P_pad, CKRp), jnp.bfloat16),
        jax.ShapeDtypeStruct((B, P_pad, 1), jnp.int32),
    )
    grid_spec = pltpu.PrefetchScalarGridSpec(
        num_scalar_prefetch=0,
        grid=(B, n_p, n_l),
        in_specs=[
            pl.BlockSpec((1, tP, CKp), lambda b, p, l: (b, p, 0)),
            pl.BlockSpec((1, CKp, tL), lambda b, p, l: (b, 0, l)),
            pl.BlockSpec((1, tL, CKRp), lambda b, p, l: (b, l, 0)),
            pl.BlockSpec((1, 3, tL), lambda b, p, l: (b, 0, l)),
        ],
        out_specs=(
            pl.BlockSpec((1, tP, CKRp), lambda b, p, l: (b, p, 0)),
            pl.BlockSpec((1, tP, 1), lambda b, p, l: (b, p, 0)),
        ),
        scratch_shapes=[
            pltpu.VMEM((tP, 1), jnp.float32),       # running max m
            pltpu.VMEM((tP, 1), jnp.float32),       # running denom l
            pltpu.VMEM((tP, CKRp), jnp.float32),    # running acc (attn @ raw)
            pltpu.VMEM((tP, 1), jnp.float32),       # best arg value (mask path only)
            pltpu.VMEM((tP, 1), jnp.int32),         # best arg index
        ],
    )
    return pl.pallas_call(
        kernel,
        out_shape=out_shape,
        grid_spec=grid_spec,
        compiler_params=pltpu.CompilerParams(
            dimension_semantics=("parallel", "parallel", "arbitrary"),
            vmem_limit_bytes=vmem_limit),
    )(f_patches, w_t, raw_patches, scale_rows)


# Pure-JAX reference for the same hot path (used only for a sanity check).
def _attention_ref(f_patches, w_t, raw_patches, scale_rows, **_):
    fp = f_patches.astype(jnp.float32)
    wt = w_t.astype(jnp.float32)
    rw = raw_patches.astype(jnp.float32)
    row_scale = scale_rows[:, 0:1, :]
    smax_bias = scale_rows[:, 1:2, :]
    arg_bias = scale_rows[:, 2:3, :]
    scaled = jnp.einsum("bpc,bcl->bpl", fp, wt,
                        precision=jax.lax.Precision.HIGHEST) * row_scale
    attn = jax.nn.softmax(scaled + smax_bias, axis=2)
    arg = jnp.argmax(scaled + arg_bias, axis=2).astype(jnp.int32)
    out = jnp.einsum("bpl,blc->bpc", attn, rw,
                     precision=jax.lax.Precision.HIGHEST)
    return out.astype(jnp.bfloat16), arg[:, :, None]


# ---------------------------------------------------------------------------
# Forward wrapper (mirrors ContextualAttention.forward)
# ---------------------------------------------------------------------------
def contextual_attention(f, b, mask=None, *, ksize=KSIZE, stride=STRIDE,
                         rate=RATE, attention_fn=_attention_pallas):
    N, C, Hf, Wf = f.shape
    kernel = 2 * rate

    # raw (2*rate)x(2*rate) background patches at stride=rate (for reconstruction)
    raw_patches, _, _ = _unfold_same(b, kernel, rate * stride)      # [N, L, C*kernel^2]
    CKR = raw_patches.shape[2]

    # nearest downsample by `rate` (F.interpolate(scale_factor=1/rate, mode='nearest'))
    fd = f[:, :, ::rate, ::rate]
    bd = b[:, :, ::rate, ::rate]
    Hfd, Wfd = fd.shape[2], fd.shape[3]
    Hbd, Wbd = bd.shape[2], bd.shape[3]

    # 3x3 matching patches of downsampled background
    w_patches, _, _ = _unfold_same(bd, ksize, stride)               # [N, L, C*9]
    L = w_patches.shape[1]
    CK = w_patches.shape[2]

    # valid-background mask mm (ones when mask is None, as in the module)
    has_mask = mask is not None
    if mask is None:
        mask = jnp.zeros((N, 1, Hbd, Wbd), jnp.float32)
    # TODO(synk): provided-mask path in torch does F.interpolate(1/(4*rate)) first;
    # only the mask=None default is exercised here.
    m_patches, _, _ = _unfold_same(mask, ksize, stride)             # [N, L, 9]
    mm_vec = (jnp.mean(m_patches[0], axis=1) == 0.0).astype(jnp.float32)     # [L]

    # fold wi-normalization (max(||wi||,1e-4)), mask, and softmax scale into one
    # per-column row-scale vector (per-column scaling commutes with the matmul)
    norm = jnp.sqrt(jnp.sum(w_patches.astype(jnp.float32) ** 2, axis=2))     # [N, L]
    row_scale = mm_vec[None, :] * SOFTMAX_SCALE / jnp.maximum(norm, 1e-4)    # [N, L]

    # fold the valid-background mask into the raw patches (zero rows for masked
    # columns) -> no trailing (P, L) multiply in the kernel, output unchanged
    raw_patches = raw_patches * mm_vec[None, :, None]

    # 3x3 patches of the same-padded downsampled foreground
    f_patches, _, _ = _unfold_same(fd, ksize, 1)                    # [N, P, C*9]
    P = f_patches.shape[1]

    # --- tiling / lane-dense zero padding ---------------------------------
    CK_pad = _round_up(CK, 128)      # contraction dim of scores matmul
    CKR_pad = _round_up(CKR, 128)    # lane dim of output matmul
    if P <= _TP_TARGET:
        tP = _round_up(P, 16)
        P_pad = tP
    else:
        tP = _TP_TARGET
        P_pad = _round_up(P, tP)
    # v7x has 2 TensorCores/chip: expose at least 2 parallel grid points
    if N * (P_pad // tP) < 2 and tP >= 256 and tP % 256 == 0:
        tP //= 2
    L_pad = _round_up(L, 128)
    if L_pad > _TL_TARGET:
        tL = _TL_TARGET
        L_pad = _round_up(L, tL)
    else:
        tL = L_pad

    if CK_pad != CK:
        f_patches = jnp.pad(f_patches, ((0, 0), (0, 0), (0, CK_pad - CK)))
        w_patches = jnp.pad(w_patches, ((0, 0), (0, 0), (0, CK_pad - CK)))
    if P_pad != P:
        f_patches = jnp.pad(f_patches, ((0, 0), (0, P_pad - P), (0, 0)))
    if CKR_pad != CKR:
        raw_patches = jnp.pad(raw_patches, ((0, 0), (0, 0), (0, CKR_pad - CKR)))
    if L_pad != L:
        w_patches = jnp.pad(w_patches, ((0, 0), (0, L_pad - L), (0, 0)))
        raw_patches = jnp.pad(raw_patches, ((0, 0), (0, L_pad - L), (0, 0)))
        row_scale = jnp.pad(row_scale, ((0, 0), (0, L_pad - L)))
        mm_pad = jnp.pad(mm_vec, (0, L_pad - L))
    else:
        mm_pad = mm_vec
    w_t = jnp.transpose(w_patches, (0, 2, 1))                       # [N, CK_pad, L_pad]

    # per-column biases: padded L columns must be excluded from the softmax
    # denominator; masked (real) columns must never win argmax
    valid_col = jnp.arange(L_pad) < L
    smax_bias = jnp.where(valid_col, 0.0, -_BIG)
    arg_bias = jnp.where(valid_col & (mm_pad > 0.0), 0.0, -_BIG)
    scale_rows = jnp.stack(
        [row_scale,
         jnp.broadcast_to(smax_bias[None, :], (N, L_pad)),
         jnp.broadcast_to(arg_bias[None, :], (N, L_pad))],
        axis=1).astype(jnp.float32)                                 # [N, 3, L_pad]

    add_pad_bias = (L_pad != L)
    separate_arg_bias = has_mask      # mask=None -> argmax shares the softmax max

    out_patches, arg = attention_fn(
        f_patches.astype(jnp.bfloat16), w_t.astype(jnp.bfloat16),
        raw_patches.astype(jnp.bfloat16), scale_rows,
        tP=tP, tL=tL, add_pad_bias=add_pad_bias,
        separate_arg_bias=separate_arg_bias)
    out_patches = out_patches[:, :P, :CKR].astype(jnp.float32)
    arg = arg[:, :P, 0]                                             # [N, P]

    # overlap-add fold == F.conv_transpose2d(attn, raw_wi, stride=rate, padding=1) / 4
    pad = 1
    full_h = (Hfd - 1) * rate + kernel
    full_w = (Wfd - 1) * rate + kernel
    p = out_patches.reshape(N, Hfd, Wfd, C, kernel, kernel)
    y_full = jnp.zeros((N, C, full_h, full_w), jnp.float32)
    for kh in range(kernel):
        for kw in range(kernel):
            y_full = y_full.at[:, :, kh:kh + (Hfd - 1) * rate + 1:rate,
                                     kw:kw + (Wfd - 1) * rate + 1:rate].add(
                jnp.transpose(p[:, :, :, :, kh, kw], (0, 3, 1, 2)))
    y = y_full[:, :, pad:full_h - pad, pad:full_w - pad] / 4.0

    # offsets (argmax coordinates relative to the query position)
    arg = arg.reshape(N, 1, Hfd, Wfd)
    if (Hbd, Wbd) != (Hfd, Wfd):
        times = float(Hfd * Wfd) / float(Hbd * Wbd)
        arg = ((arg + 1).astype(jnp.float32) * times - 1.0).astype(jnp.int32)
    offsets = jnp.concatenate([arg // Wfd, arg % Wfd], axis=1)      # [N, 2, Hfd, Wfd]
    h_add = jnp.broadcast_to(jnp.arange(Hfd, dtype=jnp.int32).reshape(1, 1, Hfd, 1),
                             (N, 1, Hfd, Wfd))
    w_add = jnp.broadcast_to(jnp.arange(Wfd, dtype=jnp.int32).reshape(1, 1, 1, Wfd),
                             (N, 1, Hfd, Wfd))
    offsets = offsets - jnp.concatenate([h_add, w_add], axis=1)
    # TODO(synk): flow_to_image (numpy color-wheel visualization) has no Pallas
    # equivalent; returning raw integer offsets instead of the RGB flow image.
    return y, offsets


if __name__ == "__main__":
    key = jax.random.PRNGKey(0)
    kf, kb = jax.random.split(key)
    B, C, H, W = 2, 4, 16, 16
    f = jax.random.normal(kf, (B, C, H, W), dtype=jnp.float32)
    b = jax.random.normal(kb, (B, C, H, W), dtype=jnp.float32)

    y_pallas, offsets = contextual_attention(f, b, attention_fn=_attention_pallas)
    y_pallas = jax.block_until_ready(y_pallas)
    offsets = jax.block_until_ready(offsets)

    # sanity check against a pure-JAX reference of the same math (same bf16 inputs)
    y_ref, _ = contextual_attention(f, b, attention_fn=_attention_ref)
    y_ref = jax.block_until_ready(y_ref)

    assert y_pallas.shape == (B, C, H, W)
    assert offsets.shape == (B, 2, H // RATE, W // RATE)
    assert bool(jnp.all(jnp.isfinite(y_pallas)))
    assert bool(jnp.allclose(y_pallas, y_ref, rtol=2e-2, atol=2e-2))
    print("KERNEL_OK")
</pallas_src>

<mosaic_0001>
module attributes {stable_mosaic.version = 11 : i64} {
  func.func @_ctx_attn_kernel(%arg0: i32, %arg1: i32, %arg2: i32, %arg3: memref<1x64x128xbf16, #tpu.memory_space<vmem>>, %arg4: memref<1x128x128xbf16, #tpu.memory_space<vmem>>, %arg5: memref<1x128x128xbf16, #tpu.memory_space<vmem>>, %arg6: memref<1x3x128xf32, #tpu.memory_space<vmem>>, %arg7: memref<1x64x128xbf16, #tpu.memory_space<vmem>>, %arg8: memref<1x64x1xi32, #tpu.memory_space<vmem>>, %arg9: memref<64x1xf32, #tpu.memory_space<vmem>>, %arg10: memref<64x1xf32, #tpu.memory_space<vmem>>, %arg11: memref<64x128xf32, #tpu.memory_space<vmem>>, %arg12: memref<64x1xf32, #tpu.memory_space<vmem>>, %arg13: memref<64x1xi32, #tpu.memory_space<vmem>>) attributes {dimension_semantics = [#tpu.dimension_semantics<parallel>, #tpu.dimension_semantics<parallel>, #tpu.dimension_semantics<arbitrary>], iteration_bounds = array<i64: 2, 1, 1>, scalar_prefetch = 0 : i64, scratch_operands = 5 : i64, tpu.core_type = #tpu.core_type<tc>, window_params = [{transform_indices = @transform_0, window_bounds = array<i64: 1, 64, 128>}, {transform_indices = @transform_1, window_bounds = array<i64: 1, 128, 128>}, {transform_indices = @transform_2, window_bounds = array<i64: 1, 128, 128>}, {transform_indices = @transform_3, window_bounds = array<i64: 1, 3, 128>}, {transform_indices = @transform_4, window_bounds = array<i64: 1, 64, 128>}, {transform_indices = @transform_5, window_bounds = array<i64: 1, 64, 1>}]} {
    %c0_i32 = arith.constant 0 : i32
    %0 = arith.cmpi eq, %arg2, %c0_i32 : i32
    %1 = arith.extui %0 : i1 to i32
    %c0_i32_0 = arith.constant 0 : i32
    %2 = arith.cmpi ne, %1, %c0_i32_0 : i32
    scf.if %2 {
      %cst_34 = arith.constant 0xFF800000 : f32
      %58 = vector.broadcast %cst_34 : f32 to vector<64x1xf32>
      %c0_35 = arith.constant 0 : index
      %c0_36 = arith.constant 0 : index
      %59 = vector.load %arg9[%c0_35, %c0_36] : memref<64x1xf32, #tpu.memory_space<vmem>>, vector<64x1xf32>
      tpu.vector_store %arg9[%c0_35, %c0_36], %58 {strides = array<i32>} : memref<64x1xf32, #tpu.memory_space<vmem>>, vector<64x1xf32>,
      %cst_37 = arith.constant 0.000000e+00 : f32
      %60 = vector.broadcast %cst_37 : f32 to vector<64x1xf32>
      %c0_38 = arith.constant 0 : index
      %c0_39 = arith.constant 0 : index
      %61 = vector.load %arg10[%c0_38, %c0_39] : memref<64x1xf32, #tpu.memory_space<vmem>>, vector<64x1xf32>
      tpu.vector_store %arg10[%c0_38, %c0_39], %60 {strides = array<i32>} : memref<64x1xf32, #tpu.memory_space<vmem>>, vector<64x1xf32>,
      %cst_40 = arith.constant 0.000000e+00 : f32
      %62 = vector.broadcast %cst_40 : f32 to vector<64x128xf32>
      %c0_41 = arith.constant 0 : index
      %c0_42 = arith.constant 0 : index
      %63 = vector.load %arg11[%c0_41, %c0_42] : memref<64x128xf32, #tpu.memory_space<vmem>>, vector<64x128xf32>
      tpu.vector_store %arg11[%c0_41, %c0_42], %62 {strides = array<i32>} : memref<64x128xf32, #tpu.memory_space<vmem>>, vector<64x128xf32>,
      %cst_43 = arith.constant 0xFF800000 : f32
      %64 = vector.broadcast %cst_43 : f32 to vector<64x1xf32>
      %c0_44 = arith.constant 0 : index
      %c0_45 = arith.constant 0 : index
      %65 = vector.load %arg12[%c0_44, %c0_45] : memref<64x1xf32, #tpu.memory_space<vmem>>, vector<64x1xf32>
      tpu.vector_store %arg12[%c0_44, %c0_45], %64 {strides = array<i32>} : memref<64x1xf32, #tpu.memory_space<vmem>>, vector<64x1xf32>,
      %c0_i32_46 = arith.constant 0 : i32
      %66 = vector.broadcast %c0_i32_46 : i32 to vector<64x1xi32>
      %c0_47 = arith.constant 0 : index
      %c0_48 = arith.constant 0 : index
      %67 = vector.load %arg13[%c0_47, %c0_48] : memref<64x1xi32, #tpu.memory_space<vmem>>, vector<64x1xi32>
      tpu.vector_store %arg13[%c0_47, %c0_48], %66 {strides = array<i32>} : memref<64x1xi32, #tpu.memory_space<vmem>>, vector<64x1xi32>,
    } else {
    }
    %c0 = arith.constant 0 : index
    %c0_1 = arith.constant 0 : index
    %c0_2 = arith.constant 0 : index
    %3 = vector.load %arg3[%c0, %c0_1, %c0_2] : memref<1x64x128xbf16, #tpu.memory_space<vmem>>, vector<1x64x128xbf16>
    %4 = vector.shape_cast %3 : vector<1x64x128xbf16> to vector<64x128xbf16>
    %c0_3 = arith.constant 0 : index
    %c0_4 = arith.constant 0 : index
    %c0_5 = arith.constant 0 : index
    %5 = vector.load %arg4[%c0_3, %c0_4, %c0_5] : memref<1x128x128xbf16, #tpu.memory_space<vmem>>, vector<1x128x128xbf16>
    %6 = vector.shape_cast %5 : vector<1x128x128xbf16> to vector<128x128xbf16>
    %c0_6 = arith.constant 0 : index
    %c0_7 = arith.constant 0 : index
    %c0_8 = arith.constant 0 : index
    %7 = vector.load %arg5[%c0_6, %c0_7, %c0_8] : memref<1x128x128xbf16, #tpu.memory_space<vmem>>, vector<1x128x128xbf16>
    %8 = vector.shape_cast %7 : vector<1x128x128xbf16> to vector<128x128xbf16>
    %c0_9 = arith.constant 0 : index
    %c0_10 = arith.constant 0 : index
    %c0_11 = arith.constant 0 : index
    %9 = vector.load %arg6[%c0_9, %c0_10, %c0_11] : memref<1x3x128xf32, #tpu.memory_space<vmem>>, vector<1x3x128xf32>
    %10 = vector.shape_cast %9 : vector<1x3x128xf32> to vector<3x128xf32>
    %11 = vector.extract_strided_slice %10 {offsets = [0, 0], sizes = [1, 128], strides = [1, 1]} : vector<3x128xf32> to vector<1x128xf32>
    %cst = arith.constant dense<0.000000e+00> : vector<64x128xf32>
    %12 = tpu.matmul %4, %6, %cst {dimension_numbers = #tpu.dot_dimension_numbers<[1], [0], [0], [1], [0, 0, 1, 1], [], []>} : vector<64x128xbf16>, vector<128x128xbf16>, vector<64x128xf32> -> vector<64x128xf32>
    %13 = vector.broadcast %11 : vector<1x128xf32> to vector<64x128xf32>
    %14 = arith.mulf %12, %13 : vector<64x128xf32>
    %15 = vector.extract_strided_slice %10 {offsets = [1, 0], sizes = [1, 128], strides = [1, 1]} : vector<3x128xf32> to vector<1x128xf32>
    %16 = vector.broadcast %15 : vector<1x128xf32> to vector<64x128xf32>
    %17 = arith.addf %14, %16 : vector<64x128xf32>
    %c0_12 = arith.constant 0 : index
    %c0_13 = arith.constant 0 : index
    %18 = vector.load %arg9[%c0_12, %c0_13] : memref<64x1xf32, #tpu.memory_space<vmem>>, vector<64x1xf32>
    %cst_14 = arith.constant dense<0xFF800000> : vector<64xf32>
    %19 = vector.multi_reduction <maximumf>, %17, %cst_14 [1] : vector<64x128xf32> to vector<64xf32>
    %20 = vector.shape_cast %19 : vector<64xf32> to vector<64x1xf32>
    %21 = arith.maximumf %18, %20 : vector<64x1xf32>
    %22 = arith.subf %18, %21 : vector<64x1xf32>
    %23 = math.exp %22 : vector<64x1xf32>
    %24 = vector.broadcast %21 : vector<64x1xf32> to vector<64x128xf32>
    %25 = arith.subf %17, %24 : vector<64x128xf32>
    %26 = math.exp %25 : vector<64x128xf32>
    %c0_15 = arith.constant 0 : index
    %c0_16 = arith.constant 0 : index
    %27 = vector.load %arg10[%c0_15, %c0_16] : memref<64x1xf32, #tpu.memory_space<vmem>>, vector<64x1xf32>
    %28 = arith.mulf %23, %27 : vector<64x1xf32>
    %cst_17 = arith.constant dense<0.000000e+00> : vector<64xf32>
    %29 = vector.multi_reduction <add>, %26, %cst_17 [1] : vector<64x128xf32> to vector<64xf32>
    %30 = vector.shape_cast %29 : vector<64xf32> to vector<64x1xf32>
    %31 = arith.addf %28, %30 : vector<64x1xf32>
    %c0_18 = arith.constant 0 : index
    %c0_19 = arith.constant 0 : index
    %32 = vector.load %arg10[%c0_18, %c0_19] : memref<64x1xf32, #tpu.memory_space<vmem>>, vector<64x1xf32>
    tpu.vector_store %arg10[%c0_18, %c0_19], %31 {strides = array<i32>} : memref<64x1xf32, #tpu.memory_space<vmem>>, vector<64x1xf32>,
    %c0_20 = arith.constant 0 : index
    %c0_21 = arith.constant 0 : index
    %33 = vector.load %arg11[%c0_20, %c0_21] : memref<64x128xf32, #tpu.memory_space<vmem>>, vector<64x128xf32>
    %34 = vector.broadcast %23 : vector<64x1xf32> to vector<64x128xf32>
    %35 = arith.mulf %34, %33 : vector<64x128xf32>
    %36 = arith.truncf %26 : vector<64x128xf32> to vector<64x128xbf16>
    %cst_22 = arith.constant dense<0.000000e+00> : vector<64x128xf32>
    %37 = tpu.matmul %36, %8, %cst_22 {dimension_numbers = #tpu.dot_dimension_numbers<[1], [0], [0], [1], [0, 0, 1, 1], [], []>} : vector<64x128xbf16>, vector<128x128xbf16>, vector<64x128xf32> -> vector<64x128xf32>
    %38 = arith.addf %35, %37 : vector<64x128xf32>
    %c0_23 = arith.constant 0 : index
    %c0_24 = arith.constant 0 : index
    %39 = vector.load %arg11[%c0_23, %c0_24] : memref<64x128xf32, #tpu.memory_space<vmem>>, vector<64x128xf32>
    tpu.vector_store %arg11[%c0_23, %c0_24], %38 {strides = array<i32>} : memref<64x128xf32, #tpu.memory_space<vmem>>, vector<64x128xf32>,
    %c0_25 = arith.constant 0 : index
    %c0_26 = arith.constant 0 : index
    %40 = vector.load %arg9[%c0_25, %c0_26] : memref<64x1xf32, #tpu.memory_space<vmem>>, vector<64x1xf32>
    tpu.vector_store %arg9[%c0_25, %c0_26], %21 {strides = array<i32>} : memref<64x1xf32, #tpu.memory_space<vmem>>, vector<64x1xf32>,
    %41 = tpu.iota {dimensions = array<i32: 1>} : vector<64x128xi32>
    %c128_i32 = arith.constant 128 : i32
    %42 = arith.muli %arg2, %c128_i32 : i32
    %43 = vector.broadcast %42 : i32 to vector<64x128xi32>
    %44 = arith.addi %41, %43 : vector<64x128xi32>
    %45 = vector.broadcast %20 : vector<64x1xf32> to vector<64x128xf32>
    %46 = arith.cmpf oeq, %17, %45 : vector<64x128xf32>
    %c2147483647_i32 = arith.constant 2147483647 : i32
    %47 = vector.broadcast %c2147483647_i32 : i32 to vector<64x128xi32>
    %48 = arith.select %46, %44, %47 : vector<64x128xi1>, vector<64x128xi32>
    %cst_27 = arith.constant dense<2147483647> : vector<64xi32>
    %49 = vector.multi_reduction <minsi>, %48, %cst_27 [1] : vector<64x128xi32> to vector<64xi32>
    %50 = vector.shape_cast %49 : vector<64xi32> to vector<64x1xi32>
    %51 = arith.cmpf ogt, %20, %18 : vector<64x1xf32>
    %c0_28 = arith.constant 0 : index
    %c0_29 = arith.constant 0 : index
    %52 = vector.load %arg13[%c0_28, %c0_29] : memref<64x1xi32, #tpu.memory_space<vmem>>, vector<64x1xi32>
    %53 = arith.select %51, %50, %52 : vector<64x1xi1>, vector<64x1xi32>
    %c0_30 = arith.constant 0 : index
    %c0_31 = arith.constant 0 : index
    %54 = vector.load %arg13[%c0_30, %c0_31] : memref<64x1xi32, #tpu.memory_space<vmem>>, vector<64x1xi32>
    tpu.vector_store %arg13[%c0_30, %c0_31], %53 {strides = array<i32>} : memref<64x1xi32, #tpu.memory_space<vmem>>, vector<64x1xi32>,
    %c0_i32_32 = arith.constant 0 : i32
    %55 = arith.cmpi eq, %arg2, %c0_i32_32 : i32
    %56 = arith.extui %55 : i1 to i32
    %c0_i32_33 = arith.constant 0 : i32
    %57 = arith.cmpi ne, %56, %c0_i32_33 : i32
    scf.if %57 {
      %c0_34 = arith.constant 0 : index
      %c0_35 = arith.constant 0 : index
      %58 = vector.load %arg10[%c0_34, %c0_35] : memref<64x1xf32, #tpu.memory_space<vmem>>, vector<64x1xf32>
      %59 = tpu.reciprocal %58 {approx = true} : vector<64x1xf32> -> vector<64x1xf32>
      %c0_36 = arith.constant 0 : index
      %c0_37 = arith.constant 0 : index
      %60 = vector.load %arg11[%c0_36, %c0_37] : memref<64x128xf32, #tpu.memory_space<vmem>>, vector<64x128xf32>
      %61 = vector.broadcast %59 : vector<64x1xf32> to vector<64x128xf32>
      %62 = arith.mulf %60, %61 : vector<64x128xf32>
      %63 = arith.truncf %62 : vector<64x128xf32> to vector<64x128xbf16>
      %c0_38 = arith.constant 0 : index
      %c0_39 = arith.constant 0 : index
      %c0_40 = arith.constant 0 : index
      %64 = vector.load %arg7[%c0_38, %c0_39, %c0_40] : memref<1x64x128xbf16, #tpu.memory_space<vmem>>, vector<1x64x128xbf16>
      %65 = vector.shape_cast %64 : vector<1x64x128xbf16> to vector<64x128xbf16>
      %66 = vector.shape_cast %63 : vector<64x128xbf16> to vector<1x64x128xbf16>
      tpu.vector_store %arg7[%c0_38, %c0_39, %c0_40], %66 {strides = array<i32>} : memref<1x64x128xbf16, #tpu.memory_space<vmem>>, vector<1x64x128xbf16>,
      %c0_41 = arith.constant 0 : index
      %c0_42 = arith.constant 0 : index
      %67 = vector.load %arg13[%c0_41, %c0_42] : memref<64x1xi32, #tpu.memory_space<vmem>>, vector<64x1xi32>
      %c0_43 = arith.constant 0 : index
      %c0_44 = arith.constant 0 : index
      %c0_45 = arith.constant 0 : index
      %68 = vector.load %arg8[%c0_43, %c0_44, %c0_45] : memref<1x64x1xi32, #tpu.memory_space<vmem>>, vector<1x64x1xi32>
      %69 = vector.shape_cast %68 : vector<1x64x1xi32> to vector<64x1xi32>
      %70 = vector.shape_cast %67 : vector<64x1xi32> to vector<1x64x1xi32>
      tpu.vector_store %arg8[%c0_43, %c0_44, %c0_45], %70 {strides = array<i32>} : memref<1x64x1xi32, #tpu.memory_space<vmem>>, vector<1x64x1xi32>,
    } else {
    }
    return
  }
  func.func @transform_0(%arg0: i32, %arg1: i32, %arg2: i32) -> (i32, i32, i32) {
    %c0_i32 = arith.constant 0 : i32
    %c0_i32_0 = arith.constant 0 : i32
    return %arg0, %arg1, %c0_i32 : i32, i32, i32
  }
  func.func @transform_1(%arg0: i32, %arg1: i32, %arg2: i32) -> (i32, i32, i32) {
    %c0_i32 = arith.constant 0 : i32
    %c0_i32_0 = arith.constant 0 : i32
    return %arg0, %c0_i32, %arg2 : i32, i32, i32
  }
  func.func @transform_2(%arg0: i32, %arg1: i32, %arg2: i32) -> (i32, i32, i32) {
    %c0_i32 = arith.constant 0 : i32
    %c0_i32_0 = arith.constant 0 : i32
    return %arg0, %arg2, %c0_i32 : i32, i32, i32
  }
  func.func @transform_3(%arg0: i32, %arg1: i32, %arg2: i32) -> (i32, i32, i32) {
    %c0_i32 = arith.constant 0 : i32
    %c0_i32_0 = arith.constant 0 : i32
    return %arg0, %c0_i32, %arg2 : i32, i32, i32
  }
  func.func @transform_4(%arg0: i32, %arg1: i32, %arg2: i32) -> (i32, i32, i32) {
    %c0_i32 = arith.constant 0 : i32
    %c0_i32_0 = arith.constant 0 : i32
    return %arg0, %arg1, %c0_i32 : i32, i32, i32
  }
  func.func @transform_5(%arg0: i32, %arg1: i32, %arg2: i32) -> (i32, i32, i32) {
    %c0_i32 = arith.constant 0 : i32
    %c0_i32_0 = arith.constant 0 : i32
    return %arg0, %arg1, %c0_i32 : i32, i32, i32
  }
}

</mosaic_0001>

<bundles_post_ra>
// kernel: tpu_custom_call.1
= control target key start
LH: loop header
LB: loop body
LE: loop exit
PB: predicated region body
PF: predicated region fallthrough
CT: control target
= control target key end

     0   :  { %s2573_s0 = inlined_call_operand.hbm [shape: bf16[2,64,128], index: 0, kind: input, shape index: {}]   ;;  %s2574_s1 = inlined_call_operand.hbm [shape: bf16[2,128,128], index: 1, kind: input, shape index: {}]   ;;  %s2575_s2 = inlined_call_operand.hbm [shape: bf16[2,128,128], index: 2, kind: input, shape index: {}]   ;;  %s2576_s3 = inlined_call_operand.vmem [shape: f32[2,3,128], index: 3, kind: input, shape index: {}]   ;;  %s2577_s4 = inlined_call_operand.hbm [shape: bf16[2,64,128], index: 4, kind: output, shape index: {0}]   ;;  %s2578_s5 = inlined_call_operand.vmem [shape: s32[2,64,1], index: 5, kind: output, shape index: {1}]  }
   0x1   :  { %2583 = sst [smem:[#allocation22_spill]] %s2574_s1 }
   0x2   :  { %11 = vsyncpa [#allocation8], 0 }
   0x3   :  { %13 = vsyncpa [#allocation8 + $0x1], 0 }
   0x4   :  { %14 = vsyncpa [#allocation11], 0 }
   0x5   :  { %16 = vsyncpa [#allocation11 + $0x1], 0 }
   0x6   :  { %17 = vsyncpa [#allocation9], 0 }
   0x7   :  { %19 = vsyncpa [#allocation9 + $0x1], 0  ;;  %s1956_s18 = smov 0   ;;  %s1958_s19 = smov 0  }
   0x8   :  { %s1960_s20 = smov 0   ;;  %s1962_s21 = smov 0  }
   0x9   :  { %s1964_s22 = smov 0   ;;  %s1966_s23 = smov 0  }
   0xa LB: > { %2584 = sst [smem:[#allocation17_spill]] %s1897_s18  ;;  %s1987_s24 = sadd.s32 4294967295, %s1917_s23   ;;  %s1917_s23 = sphi %s1966_s23, %s25_s23   ;;  %s1913_s22 = sphi %s1964_s22, %s2603_s22   ;;  %s1909_s21 = sphi %s1962_s21, %s2602_s21   ;;  %s1905_s20 = sphi %s1960_s20, %s2598_s20   ;;  %s1901_s19 = sphi %s1958_s19, %s2601_s19   ;;  %s1897_s18 = sphi %s1956_s18, %s2600_s18  }
   0xb   : > { %2585 = sst [smem:[#allocation18_spill]] %s1905_s20  ;;  %s1442_s25 = sadd.s32 4294967294, %s1917_s23  }
   0xc   : > { %s44_s26 = sadd.s32 1, %s1913_s22  ;;  %s53_s27 = sadd.s32 1, %s1905_s20 }
   0xd   : > { %p46_p0 = scmp.ge.s32.totalorder %s44_s26, 2  ;;  %p60_p1 = scmp.ne.s32.totalorder %s1905_s20, %s1901_s19 }
   0xe   : > { %p61_p2 = scmp.eq.s32.totalorder %s1917_s23, 0  ;;  %p66_p3 = scmp.ne.s32.totalorder %s1901_s19, %s1897_s18 }
   0xf   : > { %s2605_s26 = smov (%p46_p0, %s44_s26), 0  ;;  %p67_p5 = scmp.eq.s32.totalorder %s1987_s24, 0 }
  0x10   : > { %2586 = sst [smem:[#allocation19_spill]] %s2605_s26  ;;  %p1999_p4 = por %p61_p2, %p60_p1 }
  0x11   : > { %s48_s29 = ssub.s32 %s1913_s22, %s2605_s26  ;;  %p176_p6 = scmp.eq.s32.totalorder %s1987_s24, 1 }
  0x12   : > { %p51_p7 = scmp.eq.s32.totalorder %s48_s29, 0  ;;  %p2007_p8 = por %p67_p5, %p66_p3 }
  0x13   : > { %p2011_p9 = por %p176_p6, %p60_p1  ;;  %p182_p10 = scmp.eq.s32.totalorder %s1442_s25, 1 }
  0x14   : > { %s2016_s7 = scalar_select %p51_p7, %s1905_s20, %s53_s27  }
  0x15   : > { %p2018_p11 = por %p182_p10, %p66_p3  ;;  %p1444_p12 = scmp.ge.s32.totalorder %s1917_s23, 2 }
  0x16   : > { %2590 = sst [smem:[#allocation20_spill]] %s2016_s7  ;;  %p1633_p13 = scmp.lt.s32.totalorder %s1917_s23, 2 }
  0x17   : > { %s2591_s8 = scalar_select %p2018_p11, 1, 0 }
  0x18   : > { %s2025_s9 = sand.u32 1, %s1905_s20   ;;  %p2029_p0 = pnand %p1633_p13, %p1999_p4 }
  0x19   : > { %2592 = sst [smem:[#allocation21_spill]] %s2591_s8  ;;  %s254_s11 = sand.u32 1, %s1917_s23  }
  0x1a   : > { %s1448_s12 = sshll.u32 %s2025_s9, 6  ;;  %s1548_s13 = sshll.u32 %s1913_s22, 6 }
  0x1b   : > { %s258_s14 = scalar_lea.vmem [#allocation10], %s1448_s12  ;;  %s2594_s1 = sld [smem:[#allocation22_spill]] }
  0x1c   : > { %s267_s15 = sshll.u32 %s258_s14, 4  ;;  %s288_s26 = scalar_lea.hbm %s2575_s2, %s1548_s13  ;;  %s268_s15 = int_to_ptr.vmem [resolvable:$true] %s267_s15 }
  0x1d   : > { %s255_s7 = scalar_lea.sflag [#allocation11], %s254_s11  ;;  %s1919_s20 = smov 64  }
  0x1e   : > { %s1920_s8 = smov 4   ;;  %s289_s14 = sshll.u32 %s288_s26, 4  ;;  %s290_s14 = int_to_ptr.hbm [resolvable:$true] %s289_s14 }
  0x1f   : > { %s281_s18 = scalar_lea.vmem [#allocation12], %s1448_s12  ;;  %p1454_p1 = scmp.ge.s32.totalorder %s1917_s23, 1 }
  0x20   : > { %s291_s16 = sshll.u32 %s281_s18, 4  ;;  %p309_p2 = scmp.lt.s32.totalorder %s1917_s23, 3  ;;  %s292_s16 = int_to_ptr.vmem [resolvable:$true] %s291_s16 }
  0x21   : > { %s264_s25 = scalar_lea.hbm %s2594_s1, %s1548_s13  ;;  %s1445_s17 = sshll.u32 %s2025_s9, 5 }
  0x22   : > { %s265_s27 = sshll.u32 %s264_s25, 4  ;;  %p310_p3 = pnand %p1454_p1, %p309_p2  ;;  %s266_s27 = int_to_ptr.hbm [resolvable:$true] %s265_s27 }
  0x23   : > { %1625 = dma.hbm_to_vmem [thread:$0]  (!%p2029_p0), %s266_s27, 1024, %s268_s15, %s255_s7, %s1919_s20, %s1919_s20, %s1920_s8  }
  0x24   : > { %s1547_s25 = sshll.u32 %s1913_s22, 5  ;;  %s234_s1 = scalar_lea.vmem [#allocation7], %s1445_s17 }
  0x25   : > { %s241_s11 = scalar_lea.hbm %s2573_s0, %s1547_s25  ;;  %s244_s15 = sshll.u32 %s234_s1, 4  ;;  %s245_s15 = int_to_ptr.vmem [resolvable:$true] %s244_s15 }
  0x26   : > { %s242_s29 = sshll.u32 %s241_s11, 4  ;;  %s231_s26 = scalar_lea.sflag [#allocation8], %s2025_s9  ;;  %s243_s29 = int_to_ptr.hbm [resolvable:$true] %s242_s29 }
  0x27   : > { %1622 = dma.hbm_to_vmem [thread:$0]  (!%p2029_p0), %s243_s29, 512, %s245_s15, %s231_s26, %s1919_s20, %s1919_s20, %s1920_s8  }
  0x28   : > { %1628 = dma.hbm_to_vmem [thread:$0]  (!%p2029_p0), %s290_s14, 1024, %s292_s16, %s255_s7, %s1919_s20, %s1919_s20, %s1920_s8  }
  0x29   : > { %313 = sbr.rel (%p310_p3) target bundleno = 891 (0x37b), region = 36  ;;  %s2057_s18 = sand.u32 (!%p310_p3), 1, %s1901_s19  }
  0x2a   : > { %s1455_s12 = sshll.u32 (!%p310_p3), %s2057_s18, 5  ;;  %s316_s27 = scalar_lea.sflag (!%p310_p3), [#allocation8], %s2057_s18 }
  0x2b   : > { %s2063_s17 = scalar_lea.vmem (!%p310_p3), [#allocation7], %s1455_s12 }
  0x2e   : > { %1884 = dma.done.wait (%p2007_p8), %s316_s27, 512  }
  0x2f   : > { %1886 = vsyncadd (%p2007_p8), %s316_s27, 4294966784  ;;  %s325_s1 = sand.u32 1, %s1987_s24   ;;  %s1456_s20 = sshll.u32 %s2057_s18, 6 }
  0x30   : > { %s326_s7 = scalar_lea.sflag [#allocation11], %s325_s1  ;;  %s329_s8 = scalar_lea.vmem [#allocation10], %s1456_s20 }
  0x31   : > { %1888 = dma.done.wait (%p2007_p8), %s326_s7, 2048  }
  0x32   : > { %1890 = vsyncadd (%p2007_p8), %s326_s7, 4294965248  ;;  %v1562_v0 = vld [vmem:[%s329_s8 + $0x38] sm:$0xff]  ;;  %v1561_v1 = vld [vmem:[%s329_s8 + $0x30] sm:$0xff]  ;;  %p395_p4 = scmp.lt.s32.totalorder %s1909_s21, 1  ;;  %vm417_vm0 = vcmask 7168   ;;  %v1921_v19 = vmov -inf   ;;  %v948_v54 = vlaneseq }
  0x33   : > { %571 = vmatpush.bf16.msra.mxu0 %v1562_v0  ;;  %1595 = vmatpush.bf16.msra.mxu2 %v1562_v0  ;;  %v1560_v2 = vld [vmem:[%s329_s8 + $0x28] sm:$0xff]  ;;  %v1559_v3 = vld [vmem:[%s329_s8 + $0x20] sm:$0xff]  ;;  %v1558_v4 = vld [vmem:[%s329_s8 + $0x18] sm:$0xff]  ;;  %418 = vst.msk [vmem:[#allocation2] sm:$0xff] %vm417_vm0, %v1921_v19  ;;  %v1922_v40 = vmov 0   ;;  %v1923_v41 = vmov 0.0  }
  0x34   : > { %v1557_v5 = vld [vmem:[%s329_s8 + $0x10] sm:$0xff]  ;;  %v1556_v6 = vld [vmem:[%s329_s8 + $0x8] sm:$0xff]  ;;  %v1555_v7 = vld [vmem:[%s329_s8] sm:$0xff]  ;;  %s2083_s24 = scalar_select %p395_p4, %s1909_s21, 1  ;;  %419 = vst.msk [vmem:[#allocation2 + $0x8] sm:$0xff] %vm417_vm0, %v1921_v19  ;;  %1690 = vset.pattern.permute.xlu2 %v1922_v40  ;;  %1691 = vset.pattern.permute.xlu0 %v1922_v40  ;;  %v2191_v59 = vand.u32 127, %v948_v54 }
  0x35   : > { %v1551_v8 = vld [vmem:[%s2063_s17] sm:$0xff]  ;;  %v1553_v9 = vld [vmem:[%s2063_s17 + $0x10] sm:$0xff]  ;;  %v1552_v10 = vld [vmem:[%s2063_s17 + $0x8] sm:$0xff]  ;;  %420 = vst.msk [vmem:[#allocation2 + $0x10] sm:$0xff] %vm417_vm0, %v1921_v19  ;;  %1692 = vset.pattern.permute.xlu1 %v1922_v40  ;;  %s2281_s16 = scalar_lea.vmem [#allocation12], %s1456_s20  ;;  %s2522_s29 = scalar_lea.vmem [#allocation13], %s1455_s12 }
  0x36   : > { %v1554_v11 = vld [vmem:[%s2063_s17 + $0x18] sm:$0xff]  ;;  %s1459_s30 = sshll.u32 %s2083_s24, 2  ;;  %421 = vst.msk [vmem:[#allocation2 + $0x18] sm:$0xff] %vm417_vm0, %v1921_v19  ;;  %v1563_v54 = vld [vmem:[%s2281_s16] sm:$0xff]  ;;  %s1550_s25 = sshll.u32 %s2083_s24, 6 }
  0x37   : > { %572 = vmatpush.bf16.msra.mxu0 %v1561_v1  ;;  %1596 = vmatpush.bf16.msra.mxu2 %v1561_v1  ;;  %s401_s14 = scalar_lea.vmem %s2576_s3, %s1459_s30  ;;  %422 = vst.msk [vmem:[#allocation2 + $0x20] sm:$0xff] %vm417_vm0, %v1921_v19  ;;  %s2452_s11 = scalar_lea.vmem %s2578_s5, %s1550_s25 }
  0x38   : > { %v498_v12 = vld [vmem:[%s401_s14] sm:$0x7]  ;;  %423 = vst.msk [vmem:[#allocation2 + $0x28] sm:$0xff] %vm417_vm0, %v1921_v19  ;;  %s1571_s15 = sshll.u32 %s1909_s21, 5  ;;  %s1244_s17 = sshll.u32 %s2522_s29, 4  ;;  %s1245_s17 = int_to_ptr.vmem [resolvable:$true] %s1244_s17 }
  0x39   : > { %v600_v13 = vperm.slane %v498_v12, 0  ;;  %v609_v14 = vperm.slane %v498_v12, 1  ;;  %424 = vst.msk [vmem:[#allocation2 + $0x30] sm:$0xff] %vm417_vm0, %v1921_v19  ;;  %s1243_s27 = scalar_lea.hbm %s2577_s4, %s1571_s15  ;;  %s1221_s21 = scalar_lea.sflag [#allocation9], %s2057_s18 }
  0x3a   : > { %425 = vst.msk [vmem:[#allocation2 + $0x38] sm:$0xff] %vm417_vm0, %v1921_v19  ;;  %v2137_v42 = vld [vmem:[#allocation2] sm:$0xff]  ;;  %s1246_s1 = sshll.u32 %s1243_s27, 4  ;;  %s1851_s30 = scalar_lea.hbm %s2577_s4, 64  ;;  %s1247_s1 = int_to_ptr.hbm [resolvable:$true] %s1246_s1 }
  0x3b   : > { %573 = vmatpush.bf16.msra.mxu0 %v1560_v2  ;;  %1597 = vmatpush.bf16.msra.mxu2 %v1560_v2  ;;  %450 = vst.msk [vmem:[#allocation6] sm:$0xff] %vm417_vm0, %v1922_v40  ;;  %v2156_v48 = vld [vmem:[#allocation2 + $0x8] sm:$0xff]  ;;  %s1845_s20 = sshra.s32 %s1247_s1, 4  ;;  %s1846_s20 = int_to_ptr.hbm [resolvable:$true] %s1845_s20 }
  0x3c   : > { %451 = vst.msk [vmem:[#allocation6 + $0x8] sm:$0xff] %vm417_vm0, %v1922_v40  ;;  %v2183_v56 = vld [vmem:[#allocation2 + $0x10] sm:$0xff]  ;;  %s1847_s7 = scalar_lea.hbm %s1846_s20, 32  ;;  %p1852_p8 = scmp.lt.s32.totalorder %s1846_s20, %s2577_s4 }
  0x3d   : > { %452 = vst.msk [vmem:[#allocation6 + $0x10] sm:$0xff] %vm417_vm0, %v1922_v40  ;;  %v2212_v1 = vld [vmem:[#allocation2 + $0x18] sm:$0xff]  ;;  %p1848_p5 = scmp.ne.s32.totalorder %s1846_s20, %s1847_s7  ;;  %p1853_p10 = scmp.lt.s32.totalorder %s1851_s30, %s1847_s7 }
  0x3e   : > { %453 = vst.msk [vmem:[#allocation6 + $0x18] sm:$0xff] %vm417_vm0, %v1922_v40  ;;  %v2152_v46 = vld [vmem:[#allocation2 + $0x20] sm:$0xff] }
  0x3f   : > { %574 = vmatpush.bf16.msra.mxu0 %v1559_v3  ;;  %1598 = vmatpush.bf16.msra.mxu2 %v1559_v3  ;;  %454 = vst.msk [vmem:[#allocation6 + $0x20] sm:$0xff] %vm417_vm0, %v1922_v40  ;;  %v2179_v53 = vld [vmem:[#allocation2 + $0x28] sm:$0xff]  ;;  %p1849_p6 = pnand %p1848_p5, %p2011_p9  ;;  %p1854_p13 = por %p1853_p10, %p1852_p8 }
  0x40   : > { %455 = vst.msk [vmem:[#allocation6 + $0x28] sm:$0xff] %vm417_vm0, %v1922_v40  ;;  %v2208_v63 = vld [vmem:[#allocation2 + $0x30] sm:$0xff] }
  0x41   : > { %456 = vst.msk [vmem:[#allocation6 + $0x30] sm:$0xff] %vm417_vm0, %v1922_v40  ;;  %p1850_p7 = pneg %p1849_p6 }
  0x42   : > { %457 = vst.msk [vmem:[#allocation6 + $0x38] sm:$0xff] %vm417_vm0, %v1922_v40  ;;  %v1565_v40 = vld [vmem:[%s2281_s16 + $0x10] sm:$0xff] }
  0x43   : > { %575 = vmatpush.bf16.msra.mxu0 %v1558_v4  ;;  %1599 = vmatpush.bf16.msra.mxu2 %v1558_v4  ;;  %426 = vst.msk [vmem:[#allocation3] sm:$0xff] %vm417_vm0, %v1923_v41  ;;  %p1855_p0 = pnand %p1854_p13, %p1850_p7 }
  0x44   : > { %427 = vst.msk [vmem:[#allocation3 + $0x8] sm:$0xff] %vm417_vm0, %v1923_v41 }
  0x45   : > { %428 = vst.msk [vmem:[#allocation3 + $0x10] sm:$0xff] %vm417_vm0, %v1923_v41 }
  0x46   : > { %429 = vst.msk [vmem:[#allocation3 + $0x18] sm:$0xff] %vm417_vm0, %v1923_v41 }
  0x47   : > { %576 = vmatpush.bf16.msra.mxu0 %v1557_v5  ;;  %1600 = vmatpush.bf16.msra.mxu2 %v1557_v5  ;;  %430 = vst.msk [vmem:[#allocation3 + $0x20] sm:$0xff] %vm417_vm0, %v1923_v41  ;;  %v2230_v5 = vld [vmem:[#allocation2 + $0x38] sm:$0xff] }
  0x48   : > { %431 = vst.msk [vmem:[#allocation3 + $0x28] sm:$0xff] %vm417_vm0, %v1923_v41 }
  0x49   : > { %432 = vst.msk [vmem:[#allocation3 + $0x30] sm:$0xff] %vm417_vm0, %v1923_v41 }
  0x4a   : > { %433 = vst.msk [vmem:[#allocation3 + $0x38] sm:$0xff] %vm417_vm0, %v1923_v41  ;;  %v1564_v41 = vld [vmem:[%s2281_s16 + $0x8] sm:$0xff] }
  0x4b   : > { %577 = vmatpush.bf16.msra.mxu0 %v1556_v6  ;;  %1601 = vmatpush.bf16.msra.mxu2 %v1556_v6 }
  0x4f   : > { %578 = vmatpush.bf16.msra.mxu0 %v1555_v7  ;;  %1602 = vmatpush.bf16.msra.mxu2 %v1555_v7 }
  0x52   : > { %579 = vmatmul.bf16.vlgmr.msra.gmra.mxu0 %v1551_v8  ;;  %589 = vmatmul.bf16.vlgmr.msra.gmra.mxu2 %v1553_v9 }
  0x62   : > { %584 = vmatmul.bf16.gmra.mxu0 %v1552_v10  ;;  %594 = vmatmul.bf16.gmra.mxu2 %v1554_v11 }
  0xcf   : > { %v580_v15 = vpop.f32.mrf.mxu0 }
  0xd0   : > { %v601_v16 = vmul.f32 %v600_v13, %v580_v15 }
  0xd2   : > { %v2089_v17 = vadd.f32 %v609_v14, %v601_v16 }
  0xd4   : > { %626 = vmax.xlane.f32.xlu0 %v2089_v17 }
  0xd5   : > { %v590_v18 = vpop.f32.mrf.mxu2 }
  0xd6   : > { %v605_v20 = vmul.f32 %v600_v13, %v590_v18 }
  0xd7   : > { %v582_v21 = vpop.f32.mrf.mxu0 }
  0xd8   : > { %v2093_v22 = vadd.f32 %v609_v14, %v605_v20  ;;  %v602_v23 = vmul.f32 %v600_v13, %v582_v21 }
  0xda   : > { %v2095_v24 = vadd.f32 %v609_v14, %v602_v23  ;;  %634 = vmax.xlane.f32.xlu2 %v2093_v22 }
  0xdc   : > { %628 = vmax.xlane.f32.xlu0 %v2095_v24 }
  0xdd   : > { %v592_v25 = vpop.f32.mrf.mxu2 }
  0xde   : > { %v606_v26 = vmul.f32 %v600_v13, %v592_v25  ;;  %v1570_v25 = vld [vmem:[%s2281_s16 + $0x38] sm:$0xff] }
  0xdf   : > { %v585_v27 = vpop.f32.mrf.mxu0  ;;  %895 = vmatpush.bf16.msra.mxu1 %v1570_v25  ;;  %1603 = vmatpush.bf16.msra.mxu3 %v1570_v25 }
  0xe0   : > { %v2101_v28 = vadd.f32 %v609_v14, %v606_v26  ;;  %v603_v29 = vmul.f32 %v600_v13, %v585_v27 }
  0xe2   : > { %v2105_v30 = vadd.f32 %v609_v14, %v603_v29  ;;  %636 = vmax.xlane.f32.xlu2 %v2101_v28  ;;  %v1569_v29 = vld [vmem:[%s2281_s16 + $0x30] sm:$0xff] }
  0xe3   : > { %896 = vmatpush.bf16.msra.mxu1 %v1569_v29  ;;  %1604 = vmatpush.bf16.msra.mxu3 %v1569_v29 }
  0xe4   : > { %630 = vmax.xlane.f32.xlu1 %v2105_v30 }
  0xe5   : > { %v595_v31 = vpop.f32.mrf.mxu2 }
  0xe6   : > { %v607_v32 = vmul.f32 %v600_v13, %v595_v31 }
  0xe7   : > { %v587_v33 = vpop.f32.mrf.mxu0 }
  0xe8   : > { %v2112_v34 = vadd.f32 %v609_v14, %v607_v32  ;;  %v604_v35 = vmul.f32 %v600_v13, %v587_v33  ;;  %v1568_v32 = vld [vmem:[%s2281_s16 + $0x28] sm:$0xff] }
  0xe9   : > { %897 = vmatpush.bf16.msra.mxu1 %v1568_v32  ;;  %1605 = vmatpush.bf16.msra.mxu3 %v1568_v32 }
  0xea   : > { %v2114_v36 = vadd.f32 %v609_v14, %v604_v35  ;;  %638 = vmax.xlane.f32.xlu0 %v2112_v34  ;;  %v1567_v35 = vld [vmem:[%s2281_s16 + $0x20] sm:$0xff] }
  0xec   : > { %632 = vmax.xlane.f32.xlu1 %v2114_v36 }
  0xed   : > { %v597_v37 = vpop.f32.mrf.mxu2  ;;  %898 = vmatpush.bf16.msra.mxu1 %v1567_v35  ;;  %1606 = vmatpush.bf16.msra.mxu3 %v1567_v35 }
  0xee   : > { %v608_v38 = vmul.f32 %v600_v13, %v597_v37  ;;  %v1566_v37 = vld [vmem:[%s2281_s16 + $0x18] sm:$0xff] }
  0xf0   : > { %v2118_v39 = vadd.f32 %v609_v14, %v608_v38 }
  0xf1   : > { %899 = vmatpush.bf16.msra.mxu1 %v1566_v37  ;;  %1607 = vmatpush.bf16.msra.mxu3 %v1566_v37 }
  0xf4   : > { %640 = vmax.xlane.f32.xlu1 %v2118_v39 }
  0xf5   : > { %900 = vmatpush.bf16.msra.mxu1 %v1565_v40  ;;  %1608 = vmatpush.bf16.msra.mxu3 %v1565_v40 }
  0xf9   : > { %901 = vmatpush.bf16.msra.mxu1 %v1564_v41  ;;  %1609 = vmatpush.bf16.msra.mxu3 %v1564_v41 }
  0xfd   : > { %902 = vmatpush.bf16.msra.mxu1 %v1563_v54  ;;  %1610 = vmatpush.bf16.msra.mxu3 %v1563_v54 }
 0x147   : > { %v2139_v43 = vpop.xlane.xlu0 %626 }
 0x148   : > { %v2143_v44 = vmax.f32 %v2137_v42, %v2139_v43  ;;  %vm1081_vm1 = vcmp.gt.f32.partialorder %v2139_v43, %v2137_v42  ;;  %vm953_vm7 = vcmp.eq.f32.partialorder %v2089_v17, %v2139_v43 }
 0x149   : > { %v2245_v9 = vsel %vm953_vm7, %v2191_v59, 2147483647 }
 0x14a   : > { %v650_v45 = vsub.f32 %v2137_v42, %v2143_v44  ;;  %940 = vst.msk [vmem:[#allocation2] sm:$0xff] %vm417_vm0, %v2143_v44  ;;  %676 = vperm.xlu2 %1690, %v2143_v44   ;;  %v970_v10 = vshra.s32 %v2245_v9, 16 }
 0x14c   : > { %v2250_v11 = vcvt.s32.f32 %v970_v10  ;;  %v658_v41 = vmul.f32 1.442695, %v650_v45 }
 0x14d   : > { %v2154_v47 = vpop.xlane.xlu2 %634 }
 0x14e   : > { %v2160_v49 = vmax.f32 %v2152_v46, %v2154_v47  ;;  %vm1085_vm2 = vcmp.gt.f32.partialorder %v2154_v47, %v2152_v46  ;;  %vm957_vm8 = vcmp.eq.f32.partialorder %v2093_v22, %v2154_v47 }
 0x14f   : > { %v2164_v50 = vpop.xlane.xlu0 %628  ;;  %v2254_v12 = vsel %vm957_vm8, %v2191_v59, 2147483647 }
 0x150   : > { %944 = vst.msk [vmem:[#allocation2 + $0x20] sm:$0xff] %vm417_vm0, %v2160_v49  ;;  %v2170_v51 = vmax.f32 %v2156_v48, %v2164_v50  ;;  %vm1082_vm3 = vcmp.gt.f32.partialorder %v2164_v50, %v2156_v48  ;;  %v1026_v13 = vshra.s32 %v2254_v12, 16  ;;  %vm954_vm9 = vcmp.eq.f32.partialorder %v2095_v24, %v2164_v50 }
 0x151   : > { %v2262_v15 = vsel %vm954_vm9, %v2191_v59, 2147483647  ;;  %v654_v21 = vsub.f32 %v2152_v46, %v2160_v49 }
 0x152   : > { %v651_v52 = vsub.f32 %v2156_v48, %v2170_v51  ;;  %941 = vst.msk [vmem:[#allocation2 + $0x8] sm:$0xff] %vm417_vm0, %v2170_v51  ;;  %681 = vperm.xlu0 %1691, %v2170_v51   ;;  %v2259_v14 = vcvt.s32.f32 %v1026_v13  ;;  %v984_v16 = vshra.s32 %v2262_v15, 16  ;;  %v744_v48 = vld [vmem:[#allocation3 + $0x30] sm:$0xff] }
 0x153   : > { %v666_v26 = vmul.f32 1.442695, %v654_v21 }
 0x154   : > { %v2268_v18 = vcvt.s32.f32 %v984_v16 }
 0x155   : > { %v2181_v55 = vpop.xlane.xlu2 %636  ;;  %1693 = vpow2.f32 %v666_v26 }
 0x156   : > { %v2187_v57 = vmax.f32 %v2179_v53, %v2181_v55  ;;  %vm958_vm13 = vcmp.eq.f32.partialorder %v2101_v28, %v2181_v55 }
 0x157   : > { %v2189_v58 = vpop.xlane.xlu1 %630 }
 0x158   : > { %v655_v60 = vsub.f32 %v2179_v53, %v2187_v57  ;;  %945 = vst.msk [vmem:[#allocation2 + $0x28] sm:$0xff] %vm417_vm0, %v2187_v57  ;;  %v644_v61 = vmax.f32 %v2183_v56, %v2189_v58  ;;  %vm955_vm4 = vcmp.eq.f32.partialorder %v2105_v30, %v2189_v58  ;;  %vm1083_vm5 = vcmp.gt.f32.partialorder %v2189_v58, %v2183_v56 }
 0x159   : > { %701 = vperm.xlu1 %1692, %v2187_v57   ;;  %v2205_v62 = vsel %vm955_vm4, %v2191_v59, 2147483647 }
 0x15a   : > { %942 = vst.msk [vmem:[#allocation2 + $0x10] sm:$0xff] %vm417_vm0, %v644_v61  ;;  %v652_v27 = vsub.f32 %v2183_v56, %v644_v61 }
 0x15b   : > { %v2289_v33 = vpop.eup %1693 }
 0x15c   : > { %v662_v31 = vmul.f32 1.442695, %v652_v27 }
 0x15d   : > { %v2210_v0 = vpop.xlane.xlu0 %638 }
 0x15e   : > { %v2216_v2 = vmax.f32 %v2208_v63, %v2210_v0  ;;  %1695 = vpow2.f32 %v662_v31  ;;  %vm959_vm12 = vcmp.eq.f32.partialorder %v2112_v34, %v2210_v0 }
 0x15f   : > { %v2218_v3 = vpop.xlane.xlu1 %632  ;;  %v2316_v27 = vsel %vm959_vm12, %v2191_v59, 2147483647 }
 0x160   : > { %946 = vst.msk [vmem:[#allocation2 + $0x30] sm:$0xff] %vm417_vm0, %v2216_v2  ;;  %v2224_v4 = vmax.f32 %v2212_v1, %v2218_v3  ;;  %vm1084_vm6 = vcmp.gt.f32.partialorder %v2218_v3, %v2212_v1  ;;  %vm956_vm10 = vcmp.eq.f32.partialorder %v2114_v36, %v2218_v3  ;;  %v656_v54 = vsub.f32 %v2208_v63, %v2216_v2 }
 0x161   : > { %686 = vperm.xlu1 %1692, %v644_v61   ;;  %v2271_v19 = vsel %vm956_vm10, %v2191_v59, 2147483647 }
 0x162   : > { %943 = vst.msk [vmem:[#allocation2 + $0x18] sm:$0xff] %vm417_vm0, %v2224_v4  ;;  %v1012_v20 = vshra.s32 %v2271_v19, 16  ;;  %v653_v44 = vsub.f32 %v2212_v1, %v2224_v4 }
 0x164   : > { %v2277_v23 = vcvt.s32.f32 %v1012_v20  ;;  %v2294_v38 = vpop.eup %1695 }
 0x167   : > { %v2234_v6 = vpop.xlane.xlu1 %640 }
 0x168   : > { %v2238_v7 = vmax.f32 %v2230_v5, %v2234_v6  ;;  %vm960_vm11 = vcmp.eq.f32.partialorder %v2118_v39, %v2234_v6 }
 0x169   : > { %v2309_v16 = vsel %vm960_vm11, %v2191_v59, 2147483647 }
 0x16a   : > { %v657_v8 = vsub.f32 %v2230_v5, %v2238_v7  ;;  %947 = vst.msk [vmem:[#allocation2 + $0x38] sm:$0xff] %vm417_vm0, %v2238_v7  ;;  %v1068_v25 = vshra.s32 %v2309_v16, 16 }
 0x16c   : > { %v2318_v31 = vcvt.s32.f32 %v1068_v25  ;;  %v672_v40 = vmul.f32 1.442695, %v657_v8 }
 0x173   : > { %973 = vmin.xlane.f32.xlu2 %v2250_v11 }
 0x17c   : > { %1029 = vmin.xlane.f32.xlu0 %v2259_v14 }
 0x184   : > { %987 = vmin.xlane.f32.xlu0 %v2268_v18 }
 0x18b   : > { %1015 = vmin.xlane.f32.xlu1 %v2277_v23  ;;  %696 = vperm.xlu2 %1690, %v2160_v49   ;;  %v998_v49 = vshra.s32 %v2205_v62, 16 }
 0x18d   : > { %v2302_v61 = vcvt.s32.f32 %v998_v49 }
 0x198   : > { %817 = vperm.xlu0 %1691, %v2289_v33  }
 0x1a0   : > { %807 = vperm.xlu0 %1691, %v2294_v38  }
 0x1a4   : > { %711 = vperm.xlu1 %1692, %v2238_v7   ;;  %v677_v10 = vpop.permute.xlu2 %676 }
 0x1a5   : > { %v714_v13 = vsub.f32 %v2089_v17, %v677_v10  ;;  %v1054_v17 = vshra.s32 %v2316_v27, 16  ;;  %v670_v10 = vmul.f32 1.442695, %v656_v54 }
 0x1a7   : > { %v722_v20 = vmul.f32 1.442695, %v714_v13  ;;  %v2323_v32 = vcvt.s32.f32 %v1054_v17 }
 0x1a9   : > { %1697 = vpow2.f32 %v722_v20  ;;  %v664_v20 = vmul.f32 1.442695, %v653_v44  ;;  %v969_v44 = vand.u32 65535, %v2245_v9 }
 0x1ab   : > { %v971_v51 = vcvt.s32.f32 %v969_v44 }
 0x1af   : > { %v1698_v35 = vpop.eup %1697 }
 0x1b4   : > { %1001 = vmin.xlane.f32.xlu2 %v2302_v61 }
 0x1c4   : > { %v682_v21 = vpop.permute.xlu0 %681 }
 0x1c5   : > { %v715_v26 = vsub.f32 %v2095_v24, %v682_v21 }
 0x1c7   : > { %v724_v29 = vmul.f32 1.442695, %v715_v26 }
 0x1c9   : > { %1699 = vpow2.f32 %v724_v29 }
 0x1ca   : > { %1071 = vmin.xlane.f32.xlu0 %v2318_v31  ;;  %1701 = vpow2.f32 %v672_v40 }
 0x1cb   : > { %1703 = vpow2.f32 %v658_v41  ;;  %v702_v8 = vpop.permute.xlu1 %701 }
 0x1cc   : > { %706 = vperm.xlu2 %1690, %v2216_v2   ;;  %1705 = vpow2.f32 %v670_v10  ;;  %v719_v45 = vsub.f32 %v2101_v28, %v702_v8  ;;  %v660_v28 = vmul.f32 1.442695, %v651_v52 }
 0x1cd   : > { %1707 = vpow2.f32 %v664_v20 }
 0x1ce   : > { %1057 = vmin.xlane.f32.xlu1 %v2323_v32  ;;  %v732_v25 = vmul.f32 1.442695, %v719_v45 }
 0x1cf   : > { %v2326_v24 = vpop.eup %1699 }
 0x1d0   : > { %v843_v37 = vpack.c.bf16 %v2326_v24, %v1698_v35  ;;  %v2336_v49 = vpop.eup %1701  ;;  %1709 = vpow2.f32 %v732_v25 }
 0x1d1   : > { %v2341_v13 = vpop.eup %1703 }
 0x1d2   : > { %903 = vmatmul.bf16.vlgmr.msra.gmra.mxu1 %v843_v37  ;;  %v2349_v21 = vpop.eup %1705 }
 0x1d3   : > { %v2358_v17 = vpop.eup %1707  ;;  %v687_v8 = vpop.permute.xlu1 %686 }
 0x1d4   : > { %691 = vperm.xlu2 %1690, %v2224_v4   ;;  %v2356_v4 = vsel %vm958_vm13, %v2191_v59, 2147483647  ;;  %v668_v59 = vmul.f32 1.442695, %v655_v60  ;;  %v997_v60 = vand.u32 65535, %v2205_v62 }
 0x1d5   : > { %v1040_v37 = vshra.s32 %v2356_v4, 16 }
 0x1d6   : > { %v2362_v40 = vpop.eup %1709  ;;  %v999_v20 = vcvt.s32.f32 %v997_v60 }
 0x1d7   : > { %v2365_v54 = vcvt.s32.f32 %v1040_v37 }
 0x1de   : > { %832 = vperm.xlu0 %1691, %v2336_v49  }
 0x1e6   : > { %v2343_v7 = vpop.xlane.xlu2 %973 }
 0x1e7   : > { %797 = vperm.xlu1 %1692, %v2341_v13   ;;  %vm975_vm14 = vcmp.eq.f32.partialorder %v2250_v11, %v2343_v7 }
 0x1e8   : > { %v976_v57 = vsel %vm975_vm14, %v971_v51, inf }
 0x1ee   : > { %v697_v26 = vpop.permute.xlu2 %696 }
 0x1ef   : > { %v718_v2 = vsub.f32 %v2093_v22, %v697_v26  ;;  %827 = vperm.xlu1 %1692, %v2349_v21  }
 0x1f1   : > { %v730_v29 = vmul.f32 1.442695, %v718_v2 }
 0x1f3   : > { %1711 = vpow2.f32 %v730_v29 }
 0x1f4   : > { %1713 = vpow2.f32 %v660_v28 }
 0x1f5   : > { %1715 = vpow2.f32 %v668_v59 }
 0x1f7   : > { %812 = vperm.xlu1 %1692, %v2358_v17  }
 0x1f9   : > { %v1712_v22 = vpop.eup %1711 }
 0x1fa   : > { %v845_v41 = vpack.c.bf16 %v2362_v40, %v1712_v22  ;;  %v2374_v10 = vpop.eup %1713 }
 0x1fb   : > { %v2378_v45 = vpop.eup %1715 }
 0x1fc   : > { %913 = vmatmul.bf16.vlgmr.msra.gmra.mxu3 %v845_v41 }
 0x1fd   : > { %1043 = vmin.xlane.f32.xlu2 %v2365_v54 }
 0x1fe   : > { %v2383_v52 = vpop.xlane.xlu1 %1015 }
 0x1ff   : > { %vm1017_vm8 = vcmp.eq.f32.partialorder %v2277_v23, %v2383_v52  ;;  %v1067_v23 = vand.u32 65535, %v2309_v16 }
 0x208   : > { %754 = vadd.xlane.f32.xlu0 %v1698_v35 }
 0x210   : > { %762 = vadd.xlane.f32.xlu0 %v1712_v22  ;;  %v716_v22 = vsub.f32 %v2105_v30, %v687_v8 }
 0x212   : > { %v726_v62 = vmul.f32 1.442695, %v716_v22 }
 0x215   : > { %802 = vperm.xlu2 %1690, %v2374_v10  }
 0x216   : > { %v712_v25 = vpop.permute.xlu1 %711 }
 0x217   : > { %v721_v26 = vsub.f32 %v2118_v39, %v712_v25  ;;  %v2396_v39 = vpop.xlane.xlu0 %1029 }
 0x218   : > { %vm1031_vm7 = vcmp.eq.f32.partialorder %v2259_v14, %v2396_v39 }
 0x219   : > { %v736_v2 = vmul.f32 1.442695, %v721_v26 }
 0x21b   : > { %1717 = vpow2.f32 %v736_v2 }
 0x21d   : > { %822 = vperm.xlu2 %1690, %v2378_v45  }
 0x221   : > { %977 = vmin.xlane.f32.xlu1 %v976_v57  ;;  %v1718_v59 = vpop.eup %1717  ;;  %v1025_v57 = vand.u32 65535, %v2254_v12  ;;  %v2407_v12 = vpop.xlane.xlu0 %987 }
 0x222   : > { %vm989_vm9 = vcmp.eq.f32.partialorder %v2268_v18, %v2407_v12  ;;  %v1069_v18 = vcvt.s32.f32 %v1067_v23 }
 0x223   : > { %v1027_v26 = vcvt.s32.f32 %v1025_v57 }
 0x225   : > { %v1032_v2 = vsel %vm1031_vm7, %v1027_v26, inf }
 0x227   : > { %v2386_v35 = vpop.xlane.xlu2 %1001 }
 0x228   : > { %vm1003_vm15 = vcmp.eq.f32.partialorder %v2302_v61, %v2386_v35 }
 0x229   : > { %v2390_v9 = vsel %vm1003_vm15, %v999_v20, inf  ;;  %v2414_v22 = vpop.permute.xlu0 %817 }
 0x22f   : > { %v707_v11 = vpop.permute.xlu2 %706 }
 0x230   : > { %v720_v29 = vsub.f32 %v2112_v34, %v707_v11  ;;  %v1053_v34 = vand.u32 65535, %v2316_v27  ;;  %v1011_v27 = vand.u32 65535, %v2271_v19  ;;  %v983_v11 = vand.u32 65535, %v2262_v15 }
 0x231   : > { %v2417_v19 = vpop.permute.xlu0 %807 }
 0x232   : > { %v734_v37 = vmul.f32 1.442695, %v720_v29  ;;  %v1055_v60 = vcvt.s32.f32 %v1053_v34  ;;  %v985_v29 = vcvt.s32.f32 %v983_v11  ;;  %v742_v34 = vld [vmem:[#allocation3 + $0x20] sm:$0xff] }
 0x234   : > { %1719 = vpow2.f32 %v734_v37  ;;  %v990_v37 = vsel %vm989_vm9, %v985_v29, inf  ;;  %v1036_v29 = vcvt.f32.s32 %v2396_v39  ;;  %v994_v39 = vcvt.f32.s32 %v2407_v12  ;;  %v739_v12 = vld [vmem:[#allocation3 + $0x8] sm:$0xff] }
 0x235   : > { %1721 = vpow2.f32 %v726_v62  ;;  %v1039_v62 = vand.u32 65535, %v2356_v4  ;;  %v747_v3 = vmul.f32 %v2374_v10, %v739_v12 }
 0x237   : > { %v692_v41 = vpop.permute.xlu2 %691 }
 0x238   : > { %v717_v28 = vsub.f32 %v2114_v36, %v692_v41 }
 0x23a   : > { %v1720_v44 = vpop.eup %1719  ;;  %v728_v61 = vmul.f32 1.442695, %v717_v28 }
 0x23b   : > { %v846_v51 = vpack.c.bf16 %v1718_v59, %v1720_v44  ;;  %v1722_v30 = vpop.eup %1721 }
 0x23c   : > { %1723 = vpow2.f32 %v728_v61  ;;  %v738_v61 = vld [vmem:[#allocation3] sm:$0xff] }
 0x23d   : > { %918 = vmatmul.bf16.gmra.mxu3 %v846_v51  ;;  %v2419_v15 = vpop.xlane.xlu0 %1071 }
 0x23e   : > { %vm1073_vm10 = vcmp.eq.f32.partialorder %v2318_v31, %v2419_v15  ;;  %v746_v31 = vmul.f32 %v2341_v13, %v738_v61 }
 0x23f   : > { %v1074_v41 = vsel %vm1073_vm10, %v1069_v18, inf }
 0x241   : > { %v2400_v8 = vpop.xlane.xlu1 %1057 }
 0x242   : > { %v1724_v20 = vpop.eup %1723  ;;  %vm1059_vm4 = vcmp.eq.f32.partialorder %v2323_v32, %v2400_v8  ;;  %v1013_v32 = vcvt.s32.f32 %v1011_v27 }
 0x243   : > { %v1060_v36 = vsel %vm1059_vm4, %v1055_v60, inf  ;;  %v844_v25 = vpack.c.bf16 %v1724_v20, %v1722_v30 }
 0x244   : > { %1061 = vmin.xlane.f32.xlu0 %v1060_v36  ;;  %v1018_v14 = vsel %vm1017_vm8, %v1013_v32, inf }
 0x245   : > { %908 = vmatmul.bf16.gmra.mxu1 %v844_v25 }
 0x246   : > { %1033 = vmin.xlane.f32.xlu2 %v1032_v2  ;;  %v1089_v2 = vld [vmem:[#allocation6] sm:$0xff] }
 0x24c   : > { %1019 = vmin.xlane.f32.xlu0 %v1018_v14  ;;  %v1064_v14 = vcvt.f32.s32 %v2400_v8 }
 0x24e   : > { %991 = vmin.xlane.f32.xlu2 %v990_v37  ;;  %v1065_v23 = vshll.u32 %v1064_v14, 16 }
 0x254   : > { %768 = vadd.xlane.f32.xlu0 %v1718_v59  ;;  %v1041_v59 = vcvt.s32.f32 %v1039_v62  ;;  %v1095_v62 = vld [vmem:[#allocation6 + $0x30] sm:$0xff] }
 0x256   : > { %756 = vadd.xlane.f32.xlu2 %v2326_v24 }
 0x259   : > { %v2431_v16 = vpop.permute.xlu1 %797 }
 0x25e   : > { %766 = vadd.xlane.f32.xlu2 %v1720_v44  ;;  %v2429_v44 = vpop.permute.xlu0 %832 }
 0x261   : > { %v2436_v57 = vpop.permute.xlu1 %827 }
 0x266   : > { %760 = vadd.xlane.f32.xlu2 %v1724_v20 }
 0x269   : > { %v2441_v13 = vpop.permute.xlu1 %812 }
 0x26e   : > { %1075 = vmin.xlane.f32.xlu2 %v1074_v41 }
 0x270   : > { %v2425_v28 = vpop.xlane.xlu2 %1043 }
 0x271   : > { %vm1045_vm11 = vcmp.eq.f32.partialorder %v2365_v54, %v2425_v28  ;;  %v750_v54 = vmul.f32 %v2289_v33, %v742_v34 }
 0x272   : > { %v1046_v24 = vsel %vm1045_vm11, %v1041_v59, inf  ;;  %v1037_v59 = vshll.u32 %v1036_v29, 16 }
 0x273   : > { %1047 = vmin.xlane.f32.xlu1 %v1046_v24 }
 0x278   : > { %v2456_v42 = vpop.permute.xlu2 %802 }
 0x27b   : > { %v755_v51 = vpop.xlane.xlu0 %754  ;;  %1005 = vmin.xlane.f32.xlu1 %v2390_v9  ;;  %v980_v9 = vcvt.f32.s32 %v2343_v7 }
 0x27c   : > { %v770_v4 = vadd.f32 %v755_v51, %v746_v31  ;;  %v1093_v31 = vld [vmem:[#allocation6 + $0x20] sm:$0xff]  ;;  %v1022_v51 = vcvt.f32.s32 %v2383_v52  ;;  %v995_v52 = vshll.u32 %v994_v39, 16 }
 0x27d   : > { %v981_v25 = vshll.u32 %v980_v9, 16 }
 0x27e   : > { %779 = vst.msk [vmem:[#allocation3] sm:$0xff] %vm417_vm0, %v770_v4 }
 0x280   : > { %v2458_v32 = vpop.permute.xlu2 %822 }
 0x283   : > { %v763_v60 = vpop.xlane.xlu0 %762  ;;  %764 = vadd.xlane.f32.xlu1 %v2362_v40 }
 0x284   : > { %v774_v20 = vadd.f32 %v763_v60, %v750_v54  ;;  %v1023_v60 = vshll.u32 %v1022_v51, 16 }
 0x285   : > { %v1116_v40 = vld [vmem:[#allocation3] sm:$0xff] }
 0x286   : > { %783 = vst.msk [vmem:[#allocation3 + $0x20] sm:$0xff] %vm417_vm0, %v774_v20  ;;  %1725 = vrcp.f32 %v1116_v40 }
 0x28b   : > { %758 = vadd.xlane.f32.xlu1 %v1722_v30 }
 0x28c   : > { %v1726_v11 = vpop.eup %1725 }
 0x28d   : > { %v1120_v30 = vld [vmem:[#allocation3 + $0x20] sm:$0xff] }
 0x28e   : > { %1727 = vrcp.f32 %v1120_v30 }
 0x294   : > { %v978_v36 = vpop.xlane.xlu1 %977  ;;  %v1728_v43 = vpop.eup %1727 }
 0x295   : > { %v979_v26 = vcvt.f32.s32 %v978_v36 }
 0x297   : > { %v982_v27 = vadd.s32 %v981_v25, %v979_v26  ;;  %v1090_v25 = vld [vmem:[#allocation6 + $0x8] sm:$0xff]  ;;  %v745_v26 = vld [vmem:[#allocation3 + $0x38] sm:$0xff] }
 0x298   : > { %v753_v40 = vmul.f32 %v2336_v49, %v745_v26  ;;  %v752_v49 = vmul.f32 %v2349_v21, %v744_v48  ;;  %v1078_v21 = vcvt.f32.s32 %v2419_v15  ;;  %v1094_v15 = vld [vmem:[#allocation6 + $0x28] sm:$0xff]  ;;  %v1091_v26 = vld [vmem:[#allocation6 + $0x10] sm:$0xff]  ;;  %v835_v48 = vmul.f32 0.0, %v2431_v16 }
 0x299   : > { %v1097_v33 = vsel %vm1081_vm1, %v982_v27, %v1089_v2  ;;  %vm1087_vm1 = vcmp.gt.f32.partialorder %v2210_v0, %v2208_v63  ;;  %v1092_v63 = vld [vmem:[#allocation6 + $0x18] sm:$0xff] }
 0x29a   : > { %1105 = vst.msk [vmem:[#allocation6] sm:$0xff] %vm417_vm0, %v1097_v33 }
 0x2a1   : > { %v1204_v7 = vld [vmem:[#allocation6] sm:$0xff] }
 0x2a2   : > { %1212 = vst.msk [vmem:[%s2452_s11] sm:$0xff] %vm417_vm0, %v1204_v7 }
 0x2a4   : > { %1142 = vperm.xlu1 %1692, %v1726_v11  }
 0x2ac   : > { %1162 = vperm.xlu1 %1692, %v1728_v43  }
 0x2b7   : > { %v1062_v37 = vpop.xlane.xlu0 %1061 }
 0x2b8   : > { %v1063_v18 = vcvt.f32.s32 %v1062_v37 }
 0x2b9   : > { %v1034_v41 = vpop.xlane.xlu2 %1033 }
 0x2ba   : > { %v1066_v24 = vadd.s32 %v1065_v23, %v1063_v18  ;;  %v1035_v61 = vcvt.f32.s32 %v1034_v41  ;;  %v741_v23 = vld [vmem:[#allocation3 + $0x18] sm:$0xff] }
 0x2bc   : > { %v1103_v4 = vsel %vm1087_vm1, %v1066_v24, %v1095_v62  ;;  %v1038_v34 = vadd.s32 %v1037_v59, %v1035_v61  ;;  %v749_v62 = vmul.f32 %v2358_v17, %v741_v23 }
 0x2bd   : > { %1111 = vst.msk [vmem:[#allocation6 + $0x30] sm:$0xff] %vm417_vm0, %v1103_v4  ;;  %v1050_v4 = vcvt.f32.s32 %v2425_v28  ;;  %v1008_v28 = vcvt.f32.s32 %v2386_v35 }
 0x2be   : > { %v1101_v8 = vsel %vm1085_vm2, %v1038_v34, %v1093_v31  ;;  %v1079_v31 = vshll.u32 %v1078_v21, 16  ;;  %v1096_v34 = vld [vmem:[#allocation6 + $0x38] sm:$0xff]  ;;  %vm1088_vm2 = vcmp.gt.f32.partialorder %v2234_v6, %v2230_v5  ;;  %v842_v21 = vmul.f32 0.0, %v2429_v44 }
 0x2bf   : > { %1109 = vst.msk [vmem:[#allocation6 + $0x20] sm:$0xff] %vm417_vm0, %v1101_v8  ;;  %v1020_v54 = vpop.xlane.xlu0 %1019 }
 0x2c0   : > { %v1021_v20 = vcvt.f32.s32 %v1020_v54 }
 0x2c1   : > { %v992_v0 = vpop.xlane.xlu2 %991 }
 0x2c2   : > { %v1024_v9 = vadd.s32 %v1023_v60, %v1021_v20  ;;  %v993_v36 = vcvt.f32.s32 %v992_v0  ;;  %v1051_v60 = vshll.u32 %v1050_v4, 16 }
 0x2c4   : > { %v1210_v2 = vld [vmem:[#allocation6 + $0x30] sm:$0xff]  ;;  %v1100_v46 = vsel %vm1084_vm6, %v1024_v9, %v1092_v63  ;;  %v996_v47 = vadd.s32 %v995_v52, %v993_v36  ;;  %v1009_v36 = vshll.u32 %v1008_v28, 16  ;;  %v839_v28 = vmul.f32 0.0, %v2414_v22 }
 0x2c5   : > { %1218 = vst.msk [vmem:[%s2452_s11 + $0x30] sm:$0xff] %vm417_vm0, %v1210_v2 }
 0x2c6   : > { %v1208_v27 = vld [vmem:[#allocation6 + $0x20] sm:$0xff]  ;;  %1108 = vst.msk [vmem:[#allocation6 + $0x18] sm:$0xff] %vm417_vm0, %v1100_v46  ;;  %v1098_v33 = vsel %vm1082_vm3, %v996_v47, %v1090_v25  ;;  %vm1086_vm3 = vcmp.gt.f32.partialorder %v2181_v55, %v2179_v53  ;;  %v743_v47 = vld [vmem:[#allocation3 + $0x28] sm:$0xff] }
 0x2c7   : > { %1216 = vst.msk [vmem:[%s2452_s11 + $0x20] sm:$0xff] %vm417_vm0, %v1208_v27  ;;  %v769_v7 = vpop.xlane.xlu0 %768  ;;  %v751_v35 = vmul.f32 %v2378_v45, %v743_v47 }
 0x2c8   : > { %1106 = vst.msk [vmem:[#allocation6 + $0x8] sm:$0xff] %vm417_vm0, %v1098_v33  ;;  %v777_v1 = vadd.f32 %v769_v7, %v753_v40  ;;  %v740_v33 = vld [vmem:[#allocation3 + $0x10] sm:$0xff] }
 0x2c9   : > { %v757_v30 = vpop.xlane.xlu2 %756  ;;  %v748_v7 = vmul.f32 %v2294_v38, %v740_v33 }
 0x2ca   : > { %786 = vst.msk [vmem:[#allocation3 + $0x38] sm:$0xff] %vm417_vm0, %v777_v1  ;;  %v771_v11 = vadd.f32 %v757_v30, %v747_v3 }
 0x2cc   : > { %780 = vst.msk [vmem:[#allocation3 + $0x8] sm:$0xff] %vm417_vm0, %v771_v11  ;;  %v904_v11 = vpop.f32.mrf.mxu1 }
 0x2cd   : > { %v1207_v43 = vld [vmem:[#allocation6 + $0x18] sm:$0xff] }
 0x2ce   : > { %1215 = vst.msk [vmem:[%s2452_s11 + $0x18] sm:$0xff] %vm417_vm0, %v1207_v43  ;;  %v914_v43 = vpop.f32.mrf.mxu3 }
 0x2cf   : > { %v1205_v50 = vld [vmem:[#allocation6 + $0x8] sm:$0xff] }
 0x2d0   : > { %1213 = vst.msk [vmem:[%s2452_s11 + $0x8] sm:$0xff] %vm417_vm0, %v1205_v50  ;;  %v836_v50 = vmul.f32 0.0, %v2456_v42 }
 0x2d1   : > { %v767_v14 = vpop.xlane.xlu2 %766  ;;  %v1123_v29 = vld [vmem:[#allocation3 + $0x38] sm:$0xff] }
 0x2d2   : > { %v776_v37 = vadd.f32 %v767_v14, %v752_v49  ;;  %1729 = vrcp.f32 %v1123_v29  ;;  %v924_v14 = vadd.f32 %v904_v11, %v835_v48 }
 0x2d3   : > { %v1117_v10 = vld [vmem:[#allocation3 + $0x8] sm:$0xff] }
 0x2d4   : > { %785 = vst.msk [vmem:[#allocation3 + $0x30] sm:$0xff] %vm417_vm0, %v776_v37  ;;  %1731 = vrcp.f32 %v1117_v10  ;;  %v906_v38 = vpop.f32.mrf.mxu1 }
 0x2d5   : > { %v925_v29 = vadd.f32 %v906_v38, %v836_v50 }
 0x2d8   : > { %v1730_v18 = vpop.eup %1729 }
 0x2d9   : > { %1177 = vperm.xlu1 %1692, %v1730_v18   ;;  %v761_v41 = vpop.xlane.xlu2 %760  ;;  %v916_v18 = vpop.f32.mrf.mxu3 }
 0x2da   : > { %v1732_v59 = vpop.eup %1731  ;;  %v773_v24 = vadd.f32 %v761_v41, %v749_v62 }
 0x2db   : > { %1147 = vperm.xlu0 %1691, %v1732_v59   ;;  %v1122_v0 = vld [vmem:[#allocation3 + $0x30] sm:$0xff] }
 0x2dc   : > { %782 = vst.msk [vmem:[#allocation3 + $0x18] sm:$0xff] %vm417_vm0, %v773_v24  ;;  %v909_v24 = vpop.f32.mrf.mxu1 }
 0x2e1   : > { %v1076_v61 = vpop.xlane.xlu2 %1075  ;;  %v919_v41 = vpop.f32.mrf.mxu3 }
 0x2e2   : > { %v1077_v51 = vcvt.f32.s32 %v1076_v61  ;;  %v841_v61 = vmul.f32 0.0, %v2436_v57 }
 0x2e3   : > { %v1119_v39 = vld [vmem:[#allocation3 + $0x18] sm:$0xff] }
 0x2e4   : > { %v1080_v8 = vadd.s32 %v1079_v31, %v1077_v51  ;;  %1733 = vrcp.f32 %v1119_v39  ;;  %v930_v51 = vadd.f32 %v919_v41, %v841_v61  ;;  %v911_v39 = vpop.f32.mrf.mxu1 }
 0x2e5   : > { %1735 = vrcp.f32 %v1122_v0 }
 0x2e6   : > { %v1104_v17 = vsel %vm1088_vm2, %v1080_v8, %v1096_v34  ;;  %v1048_v54 = vpop.xlane.xlu1 %1047 }
 0x2e7   : > { %1112 = vst.msk [vmem:[#allocation6 + $0x38] sm:$0xff] %vm417_vm0, %v1104_v17  ;;  %v1049_v20 = vcvt.f32.s32 %v1048_v54  ;;  %v837_v54 = vmul.f32 0.0, %v2417_v19  ;;  %v928_v19 = vadd.f32 %v914_v43, %v839_v28 }
 0x2e9   : > { %v1052_v63 = vadd.s32 %v1051_v60, %v1049_v20  ;;  %v921_v42 = vpop.f32.mrf.mxu3  ;;  %v838_v60 = vmul.f32 0.0, %v2441_v13 }
 0x2ea   : > { %v1734_v52 = vpop.eup %1733  ;;  %v931_v4 = vadd.f32 %v921_v42, %v842_v21 }
 0x2eb   : > { %v1102_v9 = vsel %vm1086_vm3, %v1052_v63, %v1094_v15  ;;  %1157 = vperm.xlu0 %1691, %v1734_v52   ;;  %v1736_v46 = vpop.eup %1735  ;;  %v926_v15 = vadd.f32 %v909_v24, %v837_v54  ;;  %v927_v63 = vadd.f32 %v911_v39, %v838_v60 }
 0x2ec   : > { %1110 = vst.msk [vmem:[#allocation6 + $0x28] sm:$0xff] %vm417_vm0, %v1102_v9  ;;  %v840_v9 = vmul.f32 0.0, %v2458_v32 }
 0x2ee   : > { %v1211_v5 = vld [vmem:[#allocation6 + $0x38] sm:$0xff]  ;;  %v1006_v6 = vpop.xlane.xlu1 %1005  ;;  %v929_v13 = vadd.f32 %v916_v18, %v840_v9 }
 0x2ef   : > { %1219 = vst.msk [vmem:[%s2452_s11 + $0x38] sm:$0xff] %vm417_vm0, %v1211_v5  ;;  %v1007_v25 = vcvt.f32.s32 %v1006_v6 }
 0x2f1   : > { %v1010_v2 = vadd.s32 %v1009_v36, %v1007_v25 }
 0x2f3   : > { %v1209_v53 = vld [vmem:[#allocation6 + $0x28] sm:$0xff]  ;;  %v1099_v55 = vsel %vm1083_vm5, %v1010_v2, %v1091_v26  ;;  %1172 = vperm.xlu0 %1691, %v1736_v46  }
 0x2f4   : > { %1217 = vst.msk [vmem:[%s2452_s11 + $0x28] sm:$0xff] %vm417_vm0, %v1209_v53 }
 0x2f5   : > { %1107 = vst.msk [vmem:[#allocation6 + $0x10] sm:$0xff] %vm417_vm0, %v1099_v55 }
 0x2f6   : > { %v765_v12 = vpop.xlane.xlu1 %764 }
 0x2f7   : > { %v775_v27 = vadd.f32 %v765_v12, %v751_v35 }
 0x2f9   : > { %784 = vst.msk [vmem:[#allocation3 + $0x28] sm:$0xff] %vm417_vm0, %v775_v27 }
 0x2fc   : > { %v1206_v40 = vld [vmem:[#allocation6 + $0x10] sm:$0xff] }
 0x2fd   : > { %1214 = vst.msk [vmem:[%s2452_s11 + $0x10] sm:$0xff] %vm417_vm0, %v1206_v40 }
 0x2fe   : > { %v759_v1 = vpop.xlane.xlu1 %758 }
 0x2ff   : > { %v772_v56 = vadd.f32 %v759_v1, %v748_v7 }
 0x300   : > { %v1121_v3 = vld [vmem:[#allocation3 + $0x28] sm:$0xff] }
 0x301   : > { %781 = vst.msk [vmem:[#allocation3 + $0x10] sm:$0xff] %vm417_vm0, %v772_v56 }
 0x308   : > { %v1118_v58 = vld [vmem:[#allocation3 + $0x10] sm:$0xff] }
 0x309   : > { %1737 = vrcp.f32 %v1118_v58 }
 0x30a   : > { %1739 = vrcp.f32 %v1121_v3 }
 0x30f   : > { %v1738_v30 = vpop.eup %1737 }
 0x310   : > { %1152 = vperm.xlu2 %1690, %v1738_v30   ;;  %v1740_v45 = vpop.eup %1739 }
 0x316   : > { %v1143_v49 = vpop.permute.xlu1 %1142 }
 0x317   : > { %v1180_v10 = vmul.f32 %v1143_v49, %v924_v14 }
 0x318   : > { %1167 = vperm.xlu2 %1690, %v1740_v45  }
 0x31e   : > { %v1163_v59 = vpop.permute.xlu1 %1162 }
 0x31f   : > { %v1184_v6 = vmul.f32 %v1163_v59, %v928_v19 }
 0x34b   : > { %v1178_v31 = vpop.permute.xlu1 %1177 }
 0x34c   : > { %v1187_v8 = vmul.f32 %v1178_v31, %v931_v4 }
 0x34d   : > { %v1148_v37 = vpop.permute.xlu0 %1147 }
 0x34e   : > { %v1181_v23 = vmul.f32 %v1148_v37, %v925_v29 }
 0x350   : > { %v1575_v62 = vpack.c.bf16 %v1181_v23, %v1180_v10 }
 0x352   : > { %1576 = vst [vmem:[%s2522_s29] sm:$0xff] %v1575_v62  }
 0x35d   : > { %v1158_v16 = vpop.permute.xlu0 %1157 }
 0x35e   : > { %v1183_v57 = vmul.f32 %v1158_v16, %v927_v63 }
 0x365   : > { %v1173_v34 = vpop.permute.xlu0 %1172 }
 0x366   : > { %v1186_v17 = vmul.f32 %v1173_v34, %v930_v51 }
 0x368   : > { %v1590_v20 = vpack.c.bf16 %v1187_v8, %v1186_v17 }
 0x36a   : > { %1594 = vst [vmem:[%s2522_s29 + $0x18] sm:$0xff] %v1590_v20   ;;  %v1153_v44 = vpop.permute.xlu2 %1152 }
 0x36b   : > { %v1182_v0 = vmul.f32 %v1153_v44, %v926_v15 }
 0x36d   : > { %v1580_v52 = vpack.c.bf16 %v1183_v57, %v1182_v0 }
 0x36f   : > { %1592 = vst [vmem:[%s2522_s29 + $0x8] sm:$0xff] %v1580_v52  }
 0x372   : > { %v1168_v5 = vpop.permute.xlu2 %1167 }
 0x373   : > { %v1185_v36 = vmul.f32 %v1168_v5, %v929_v13 }
 0x375   : > { %v1585_v25 = vpack.c.bf16 %v1185_v36, %v1184_v6 }
 0x377   : > { %1593 = vst [vmem:[%s2522_s29 + $0x10] sm:$0xff] %v1585_v25  }
 0x378   : > { %1858 = shalt.err (!%p1855_p0)
}
 0x379   : > { %s1924_s18 = smov 64   ;;  %s1925_s14 = smov 4  }
 0x37a   : > { %1617 = dma.vmem_to_hbm [thread:$0]  (%p2011_p9), %s1245_s17, 512, %s1247_s1, %s1221_s21, %s1924_s18, %s1924_s18, %s1925_s14  }
 0x37b PF: > { %s2595_s16 = sld [smem:[#allocation17_spill]]  ;;  %p1630_p1 = pnand %p1444_p12, %p2018_p11 }
 0x37d   : > { %p1631_p2 = pneg %p1630_p1 }
 0x381   : > { %s1265_s28 = sand.u32 1, %s2595_s16  }
 0x382   : > { %s1266_s13 = scalar_lea.sflag [#allocation9], %s1265_s28 }
 0x383   : > { %1892 = dma.done.wait (%p1631_p2), %s1266_s13, 512  }
 0x384   : > { %1894 = vsyncadd (%p1631_p2), %s1266_s13, 4294966784  ;;  %s25_s23 = sadd.s32 1, %s1917_s23   ;;  %s2597_s11 = sld [smem:[#allocation18_spill]] }
 0x385   : > { %p22_p3 = scmp.ge.s32.totalorder %s25_s23, 4   ;;  %s2598_s20 = sld [smem:[#allocation20_spill]] }
 0x386   : > { %s2599_s6 = sld [smem:[#allocation19_spill]]  ;;  %s2600_s18 = smov %s1901_s19 }
 0x387   : > { %s2602_s21 = smov %s1913_s22 }
 0x388   :  { %24 = sbr.rel (!%p22_p3) target bundleno = 10 (0xa), region = 128 }
 0x38a   : > { %s2601_s19 = smov %s2597_s11 }
 0x38c   : > { %s2603_s22 = smov %s2599_s6 }
 0x38d   :  { %1284 = vsyncpa [#allocation8], 1 }
 0x38e   :  { %1286 = vsyncpa [#allocation8 + $0x1], 1 }
 0x38f   :  { %1287 = vsyncpa [#allocation11], 1 }
 0x390   :  { %1289 = vsyncpa [#allocation11 + $0x1], 1 }
 0x391   :  { %1290 = vsyncpa [#allocation9], 1 }
 0x392   :  { %1292 = vsyncpa [#allocation9 + $0x1], 1 }

</bundles_post_ra>
